<compile_context>
chip_gen: v5e
topology: v5e:2x2
jax: 0.10.0
libtpu: 0.0.40
codegen_flags: <defaults>
</compile_context>

<pallas_src>
import math

import jax
import jax.numpy as jnp
from jax.experimental import pallas as pl
from jax.experimental.pallas import tpu as pltpu

EPS = 1e-5              # BatchNorm eps
TASK_N = 3              # len(task_name)
GATE = 64               # gate_dimension
OUT_LANES = 128         # lane-dense output tile width (sliced to TASK_N outside)
B = 8                   # default batch size for the small test (multiple of 8)
WDT = jnp.bfloat16      # weight / matmul-activation dtype


def _leaky(x):
    # LeakyReLU(0.01): mul + max instead of compare + select.
    return jnp.maximum(x, 0.01 * x)


# ----------------------------------------------------------------------------
# Pallas kernel: 10 matmuls, no transcendentals, no cross-lane reductions.
# ----------------------------------------------------------------------------
def multigate_kernel(
    xc_ref, xm_ref,
    cw1, cb1, mw1, mb1,                 # encoder layer 1 (512->256, 1024->256)
    cw2e, mw2e, b2cat,                  # fused encoder layer 2 -> [hc2|hm2] (B,256)
    w3bd, b3cat,                        # block-diag encoder layer 3 -> [hc3|hm3] (B,128)
    nw1bd, nb1cat, nw2bd, nb2cat,       # block-diag fused gate nets -> [g0|g1]
    w1big, tb1cat,                      # consensus softmax folded into tower layer 1
    tw2bd, tb2cat,                      # block-diag tower layer 2
    fwbd, fb,                           # block-diag final Linear(16->1)*3, lane-padded
    out_ref,
):
    def mm(h, w_ref):
        return jnp.dot(h, w_ref[...], preferred_element_type=jnp.float32)

    def ff(h, w_ref, b_ref):
        # Linear (+ folded BN) + LeakyReLU: f32 accumulate/activate, bf16 out.
        return _leaky(mm(h, w_ref) + b_ref[...]).astype(WDT)

    # branch encoders, first layer each
    hc1 = ff(xc_ref[...], cw1, cb1)                               # (TB, 256)
    hm1 = ff(xm_ref[...], mw1, mb1)                               # (TB, 256)

    # fused 2nd encoder layer: both branches land in disjoint lane halves of
    # a (TB, 256) tile -> full MXU column width on v6e/v7x, one LeakyReLU.
    h2 = _leaky(mm(hc1, cw2e) + mm(hm1, mw2e) + b2cat[...]).astype(WDT)   # (TB, 256)

    # block-diagonal 3rd encoder layer -> [hc | hm] (TB, 128)
    hcat = ff(h2, w3bd, b3cat)

    # block-diag fused per-branch gate nets (64->128->GATE each) -> [g0 | g1]
    g = ff(ff(hcat, nw1bd, nb1cat), nw2bd, nb2cat)                # (TB, 128)

    # consensus softmax gating folded into w1big (parameter-only), so the
    # gating + all TASK_N towers are three block-diagonal matmuls.
    t1 = ff(g, w1big, tb1cat)                                     # (TB, TASK_N*32)
    t2 = ff(t1, tw2bd, tb2cat)                                    # (TB, TASK_N*16)

    # fused final Linear layers, lane-padded to 128 -> unmasked full-lane store.
    out_ref[...] = (mm(t2, fwbd) + fb[...]).astype(out_ref.dtype)


def _pick_tile(batch, cap=512):
    """Largest multiple-of-8 divisor of `batch` that (a) is <= cap and
    (b) leaves >= 2 grid steps whenever batch >= 16 (v7x megacore)."""
    if batch <= 8:
        return batch
    target = min(cap, batch // 2)
    target = max(8, (target // 8) * 8)
    for tb in range(target, 7, -8):
        if batch % tb == 0:
            return tb
    return 8


def multigate_forward(x_cddd, x_morgan, fused):
    batch = x_cddd.shape[0]
    assert batch % 8 == 0, "batch must be a multiple of 8 (f32/bf16 sublane tile)"
    tb = _pick_tile(batch)
    grid = (batch // tb,)

    ins = (x_cddd.astype(WDT), x_morgan.astype(WDT)) + tuple(fused)

    def act_spec(feat):
        return pl.BlockSpec((tb, feat), lambda i: (i, 0))

    def resident(a):
        # Constant block index across the batch grid -> weight stays resident
        # in VMEM (no re-DMA per grid step).
        return pl.BlockSpec(a.shape, lambda i: (0,) * a.ndim)

    in_specs = [act_spec(x_cddd.shape[1]), act_spec(x_morgan.shape[1])]
    in_specs += [resident(a) for a in fused]

    # advisory cost estimate for the XLA scheduler
    flops = 2 * batch * sum(int(w.shape[0]) * int(w.shape[1])
                            for w in fused if w.ndim == 2 and w.shape[0] > 1)
    bytes_accessed = sum(int(a.nbytes) for a in ins) + batch * OUT_LANES * 4

    out = pl.pallas_call(
        multigate_kernel,
        out_shape=jax.ShapeDtypeStruct((batch, OUT_LANES), jnp.float32),
        grid=grid,
        in_specs=in_specs,
        out_specs=pl.BlockSpec((tb, OUT_LANES), lambda i: (i, 0)),
        compiler_params=pltpu.CompilerParams(dimension_semantics=("parallel",)),
        cost_estimate=pl.CostEstimate(flops=flops, transcendentals=0,
                                      bytes_accessed=bytes_accessed),
    )(*ins)
    return out[:, :TASK_N]


# ----------------------------------------------------------------------------
# Deterministic parameter construction (glue, plain JAX).
# ----------------------------------------------------------------------------
def _linear(key, fin, fout):
    kw, kb = jax.random.split(key)
    w = jax.random.normal(kw, (fin, fout), jnp.float32) / math.sqrt(fin)
    b = jax.random.normal(kb, (fout,), jnp.float32) * 0.01
    return w, b


def _bn(key, n):
    kg, kb, km, kv = jax.random.split(key, 4)
    gamma = jax.random.uniform(kg, (n,), jnp.float32, 0.8, 1.2)
    beta = jax.random.normal(kb, (n,), jnp.float32) * 0.01
    mean = jax.random.normal(km, (n,), jnp.float32) * 0.01
    var = jax.random.uniform(kv, (n,), jnp.float32, 0.5, 1.5)
    return gamma, beta, mean, var


def _fold(w, b, bn):
    gamma, beta, mean, var = bn
    scale = gamma * jax.lax.rsqrt(var + EPS)
    return w * scale[None, :], b * scale + (beta - mean * scale)


def build_base_params(key):
    """Module-faithful (unfused) parameters: bf16 weights, f32 biases."""
    keys = iter(jax.random.split(key, 64))

    def folded(fin, fout):
        w, b = _linear(next(keys), fin, fout)
        w, b = _fold(w, b, _bn(next(keys), fout))
        return w.astype(WDT), b.astype(jnp.float32)

    p = {}
    # branch encoders (hidden_size [256, 128, 64])
    p['cw1'], p['cb1'] = folded(512, 256)
    p['cw2'], p['cb2'] = folded(256, 128)
    p['cw3'], p['cb3'] = folded(128, GATE)
    p['mw1'], p['mb1'] = folded(1024, 256)
    p['mw2'], p['mb2'] = folded(256, 128)
    p['mw3'], p['mb3'] = folded(128, GATE)

    # per-branch gate nets ([128, GATE])
    p['nw1'], p['nb1'], p['nw2'], p['nb2'] = [], [], [], []
    for _ in range(2):
        w, b = folded(GATE, 128); p['nw1'].append(w); p['nb1'].append(b)
        w, b = folded(128, GATE); p['nw2'].append(w); p['nb2'].append(b)

    # consensus weight (torch layout: (n_net, GATE, task_n))
    p['cons'] = jax.random.normal(next(keys), (2, GATE, TASK_N), jnp.float32)

    # per-task towers ([32, 16]) + final Linear(16 -> 1)
    p['tw1'], p['tb1'], p['tw2'], p['tb2'], p['fw'], p['fbias'] = [], [], [], [], [], []
    for _ in range(TASK_N):
        w, b = folded(GATE, 32); p['tw1'].append(w); p['tb1'].append(b)
        w, b = folded(32, 16);   p['tw2'].append(w); p['tb2'].append(b)
        w, b = _linear(next(keys), 16, 1)
        p['fw'].append(w[:, 0].astype(WDT)); p['fbias'].append(b[0])
    return p


def fuse_params(p):
    """Parameter-only preprocessing: softmax hoist + block-diagonal fusion."""
    f32 = jnp.float32
    norm = jax.nn.softmax(p['cons'].astype(f32), axis=0)   # (2, GATE, TASK_N)

    def row(b):
        return b.reshape(1, -1).astype(f32)

    # fused 2nd encoder layer: each branch in its own lane half of (tb, 256)
    cw2e = jnp.zeros((256, 256), f32).at[:, :128].set(p['cw2'].astype(f32)).astype(WDT)
    mw2e = jnp.zeros((256, 256), f32).at[:, 128:].set(p['mw2'].astype(f32)).astype(WDT)
    b2cat = jnp.concatenate([p['cb2'], p['mb2']]).reshape(1, -1).astype(f32)

    # block-diagonal 3rd encoder layer -> (256, 128)
    w3bd = jnp.zeros((256, 2 * GATE), f32)
    w3bd = w3bd.at[:128, :GATE].set(p['cw3'].astype(f32))
    w3bd = w3bd.at[128:, GATE:].set(p['mw3'].astype(f32))
    w3bd = w3bd.astype(WDT)
    b3cat = jnp.concatenate([p['cb3'], p['mb3']]).reshape(1, -1).astype(f32)

    # block-diag gate nets (two nets: GATE -> 128 -> GATE)
    nw1bd = jnp.zeros((2 * GATE, 2 * 128), f32)
    nw2bd = jnp.zeros((2 * 128, 2 * GATE), f32)
    for n in range(2):
        nw1bd = nw1bd.at[n * GATE:(n + 1) * GATE, n * 128:(n + 1) * 128].set(p['nw1'][n].astype(f32))
        nw2bd = nw2bd.at[n * 128:(n + 1) * 128, n * GATE:(n + 1) * GATE].set(p['nw2'][n].astype(f32))
    nw1bd, nw2bd = nw1bd.astype(WDT), nw2bd.astype(WDT)
    nb1cat = jnp.concatenate([p['nb1'][0], p['nb1'][1]]).reshape(1, -1).astype(f32)
    nb2cat = jnp.concatenate([p['nb2'][0], p['nb2'][1]]).reshape(1, -1).astype(f32)

    # consensus gating folded into tower layer-1; towers + final layer block-diag.
    # Final weights/bias lane-padded to OUT_LANES so the output store is lane-dense.
    w1big = jnp.zeros((2 * GATE, TASK_N * 32), f32)
    tw2bd = jnp.zeros((TASK_N * 32, TASK_N * 16), f32)
    fwbd = jnp.zeros((TASK_N * 16, OUT_LANES), f32)
    for t in range(TASK_N):
        tw1_t = p['tw1'][t].astype(f32)                                  # (GATE, 32)
        w1big = w1big.at[:GATE, t * 32:(t + 1) * 32].set(norm[0, :, t][:, None] * tw1_t)
        w1big = w1big.at[GATE:, t * 32:(t + 1) * 32].set(norm[1, :, t][:, None] * tw1_t)
        tw2bd = tw2bd.at[t * 32:(t + 1) * 32, t * 16:(t + 1) * 16].set(p['tw2'][t].astype(f32))
        fwbd = fwbd.at[t * 16:(t + 1) * 16, t].set(p['fw'][t].astype(f32))
    w1big, tw2bd, fwbd = w1big.astype(WDT), tw2bd.astype(WDT), fwbd.astype(WDT)
    tb1cat = jnp.concatenate(p['tb1']).reshape(1, -1).astype(f32)
    tb2cat = jnp.concatenate(p['tb2']).reshape(1, -1).astype(f32)
    fb = jnp.zeros((1, OUT_LANES), f32).at[0, :TASK_N].set(jnp.stack(p['fbias']).astype(f32))

    return (p['cw1'], row(p['cb1']), p['mw1'], row(p['mb1']),
            cw2e, mw2e, b2cat,
            w3bd, b3cat,
            nw1bd, nb1cat, nw2bd, nb2cat,
            w1big, tb1cat, tw2bd, tb2cat,
            fwbd, fb)


# ----------------------------------------------------------------------------
# Pure-JAX reference (unfused, module-faithful path, same bf16 base weights).
# ----------------------------------------------------------------------------
def reference_forward(xc, xm, p):
    f32 = jnp.float32

    def ff(h, w, b):
        z = jnp.dot(h.astype(WDT), w, preferred_element_type=f32) + b.astype(f32)
        return _leaky(z)

    hc = ff(ff(ff(xc, p['cw1'], p['cb1']), p['cw2'], p['cb2']), p['cw3'], p['cb3'])
    hm = ff(ff(ff(xm, p['mw1'], p['mb1']), p['mw2'], p['mb2']), p['mw3'], p['mb3'])

    g = []
    for n, h in enumerate((hc, hm)):
        z = ff(h, p['nw1'][n], p['nb1'][n])
        z = ff(z, p['nw2'][n], p['nb2'][n])
        g.append(z)

    norm = jax.nn.softmax(p['cons'].astype(f32), axis=0)   # (2, GATE, TASK_N)
    cols = []
    for t in range(TASK_N):
        ws = g[0] * norm[0, :, t] + g[1] * norm[1, :, t]
        th = ff(ws, p['tw1'][t], p['tb1'][t])
        th = ff(th, p['tw2'][t], p['tb2'][t])
        o = jnp.dot(th.astype(WDT), p['fw'][t].reshape(-1, 1),
                    preferred_element_type=f32) + p['fbias'][t]
        cols.append(o)
    return jnp.concatenate(cols, axis=1)


if __name__ == "__main__":
    key = jax.random.PRNGKey(0)
    k_data, k_params = jax.random.split(key)

    base = build_base_params(k_params)
    fused = fuse_params(base)

    # small shipped config (B=8, grid=1) and a larger batch exercising the
    # multi-step "parallel" grid (batch=256 -> tb=128, 2 grid steps).
    for batch in (B, 256):
        kc, km = jax.random.split(jax.random.fold_in(k_data, batch))
        x_cddd = jax.random.normal(kc, (batch, 512), jnp.float32).astype(WDT)
        x_morgan = jax.random.normal(km, (batch, 1024), jnp.float32).astype(WDT)

        out = jax.block_until_ready(multigate_forward(x_cddd, x_morgan, fused))
        ref = reference_forward(x_cddd, x_morgan, base)

        assert out.shape == (batch, TASK_N)
        # bf16 weights + fused (re-rounded) block-diag parameters vs. the unfused
        # reference -> loosen tolerance relative to the pure-f32 case.
        assert jnp.allclose(out, ref, atol=5e-2, rtol=5e-2), f"mismatch at batch={batch}"

    print("KERNEL_OK")
</pallas_src>

<mosaic_0001>
module attributes {stable_mosaic.version = 11 : i64} {
  func.func @multigate_kernel(%arg0: i32, %arg1: memref<8x512xbf16, #tpu.memory_space<vmem>>, %arg2: memref<8x1024xbf16, #tpu.memory_space<vmem>>, %arg3: memref<512x256xbf16, #tpu.memory_space<vmem>>, %arg4: memref<1x256xf32, #tpu.memory_space<vmem>>, %arg5: memref<1024x256xbf16, #tpu.memory_space<vmem>>, %arg6: memref<1x256xf32, #tpu.memory_space<vmem>>, %arg7: memref<256x256xbf16, #tpu.memory_space<vmem>>, %arg8: memref<256x256xbf16, #tpu.memory_space<vmem>>, %arg9: memref<1x256xf32, #tpu.memory_space<vmem>>, %arg10: memref<256x128xbf16, #tpu.memory_space<vmem>>, %arg11: memref<1x128xf32, #tpu.memory_space<vmem>>, %arg12: memref<128x256xbf16, #tpu.memory_space<vmem>>, %arg13: memref<1x256xf32, #tpu.memory_space<vmem>>, %arg14: memref<256x128xbf16, #tpu.memory_space<vmem>>, %arg15: memref<1x128xf32, #tpu.memory_space<vmem>>, %arg16: memref<128x96xbf16, #tpu.memory_space<vmem>>, %arg17: memref<1x96xf32, #tpu.memory_space<vmem>>, %arg18: memref<96x48xbf16, #tpu.memory_space<vmem>>, %arg19: memref<1x48xf32, #tpu.memory_space<vmem>>, %arg20: memref<48x128xbf16, #tpu.memory_space<vmem>>, %arg21: memref<1x128xf32, #tpu.memory_space<vmem>>, %arg22: memref<8x128xf32, #tpu.memory_space<vmem>>) attributes {dimension_semantics = [#tpu.dimension_semantics<parallel>], iteration_bounds = array<i64: 1>, scalar_prefetch = 0 : i64, scratch_operands = 0 : i64, tpu.core_type = #tpu.core_type<tc>, window_params = [{transform_indices = @transform_0, window_bounds = array<i64: 8, 512>}, {transform_indices = @transform_1, window_bounds = array<i64: 8, 1024>}, {pipeline_mode = #tpu.pipeline_mode<synchronous>, transform_indices = @transform_2, window_bounds = array<i64: 512, 256>}, {pipeline_mode = #tpu.pipeline_mode<synchronous>, transform_indices = @transform_3, window_bounds = array<i64: 1, 256>}, {pipeline_mode = #tpu.pipeline_mode<synchronous>, transform_indices = @transform_4, window_bounds = array<i64: 1024, 256>}, {pipeline_mode = #tpu.pipeline_mode<synchronous>, transform_indices = @transform_5, window_bounds = array<i64: 1, 256>}, {pipeline_mode = #tpu.pipeline_mode<synchronous>, transform_indices = @transform_6, window_bounds = array<i64: 256, 256>}, {pipeline_mode = #tpu.pipeline_mode<synchronous>, transform_indices = @transform_7, window_bounds = array<i64: 256, 256>}, {pipeline_mode = #tpu.pipeline_mode<synchronous>, transform_indices = @transform_8, window_bounds = array<i64: 1, 256>}, {pipeline_mode = #tpu.pipeline_mode<synchronous>, transform_indices = @transform_9, window_bounds = array<i64: 256, 128>}, {pipeline_mode = #tpu.pipeline_mode<synchronous>, transform_indices = @transform_10, window_bounds = array<i64: 1, 128>}, {pipeline_mode = #tpu.pipeline_mode<synchronous>, transform_indices = @transform_11, window_bounds = array<i64: 128, 256>}, {pipeline_mode = #tpu.pipeline_mode<synchronous>, transform_indices = @transform_12, window_bounds = array<i64: 1, 256>}, {pipeline_mode = #tpu.pipeline_mode<synchronous>, transform_indices = @transform_13, window_bounds = array<i64: 256, 128>}, {pipeline_mode = #tpu.pipeline_mode<synchronous>, transform_indices = @transform_14, window_bounds = array<i64: 1, 128>}, {pipeline_mode = #tpu.pipeline_mode<synchronous>, transform_indices = @transform_15, window_bounds = array<i64: 128, 96>}, {pipeline_mode = #tpu.pipeline_mode<synchronous>, transform_indices = @transform_16, window_bounds = array<i64: 1, 96>}, {pipeline_mode = #tpu.pipeline_mode<synchronous>, transform_indices = @transform_17, window_bounds = array<i64: 96, 48>}, {pipeline_mode = #tpu.pipeline_mode<synchronous>, transform_indices = @transform_18, window_bounds = array<i64: 1, 48>}, {pipeline_mode = #tpu.pipeline_mode<synchronous>, transform_indices = @transform_19, window_bounds = array<i64: 48, 128>}, {pipeline_mode = #tpu.pipeline_mode<synchronous>, transform_indices = @transform_20, window_bounds = array<i64: 1, 128>}, {transform_indices = @transform_21, window_bounds = array<i64: 8, 128>}]} {
    %c0 = arith.constant 0 : index
    %c0_0 = arith.constant 0 : index
    %0 = vector.load %arg1[%c0, %c0_0] : memref<8x512xbf16, #tpu.memory_space<vmem>>, vector<8x512xbf16>
    %c0_1 = arith.constant 0 : index
    %c0_2 = arith.constant 0 : index
    %1 = vector.load %arg3[%c0_1, %c0_2] : memref<512x256xbf16, #tpu.memory_space<vmem>>, vector<512x256xbf16>
    %cst = arith.constant dense<0.000000e+00> : vector<8x256xf32>
    %2 = tpu.matmul %0, %1, %cst {dimension_numbers = #tpu.dot_dimension_numbers<[1], [0], [0], [1], [0, 0, 1, 1], [], []>} : vector<8x512xbf16>, vector<512x256xbf16>, vector<8x256xf32> -> vector<8x256xf32>
    %c0_3 = arith.constant 0 : index
    %c0_4 = arith.constant 0 : index
    %3 = vector.load %arg4[%c0_3, %c0_4] : memref<1x256xf32, #tpu.memory_space<vmem>>, vector<1x256xf32>
    %4 = vector.broadcast %3 : vector<1x256xf32> to vector<8x256xf32>
    %5 = arith.addf %2, %4 : vector<8x256xf32>
    %cst_5 = arith.constant 0.00999999977 : f32
    %6 = vector.broadcast %cst_5 : f32 to vector<8x256xf32>
    %7 = arith.mulf %6, %5 : vector<8x256xf32>
    %8 = arith.maximumf %5, %7 : vector<8x256xf32>
    %9 = arith.truncf %8 : vector<8x256xf32> to vector<8x256xbf16>
    %c0_6 = arith.constant 0 : index
    %c0_7 = arith.constant 0 : index
    %10 = vector.load %arg2[%c0_6, %c0_7] : memref<8x1024xbf16, #tpu.memory_space<vmem>>, vector<8x1024xbf16>
    %c0_8 = arith.constant 0 : index
    %c0_9 = arith.constant 0 : index
    %11 = vector.load %arg5[%c0_8, %c0_9] : memref<1024x256xbf16, #tpu.memory_space<vmem>>, vector<1024x256xbf16>
    %cst_10 = arith.constant dense<0.000000e+00> : vector<8x256xf32>
    %12 = tpu.matmul %10, %11, %cst_10 {dimension_numbers = #tpu.dot_dimension_numbers<[1], [0], [0], [1], [0, 0, 1, 1], [], []>} : vector<8x1024xbf16>, vector<1024x256xbf16>, vector<8x256xf32> -> vector<8x256xf32>
    %c0_11 = arith.constant 0 : index
    %c0_12 = arith.constant 0 : index
    %13 = vector.load %arg6[%c0_11, %c0_12] : memref<1x256xf32, #tpu.memory_space<vmem>>, vector<1x256xf32>
    %14 = vector.broadcast %13 : vector<1x256xf32> to vector<8x256xf32>
    %15 = arith.addf %12, %14 : vector<8x256xf32>
    %cst_13 = arith.constant 0.00999999977 : f32
    %16 = vector.broadcast %cst_13 : f32 to vector<8x256xf32>
    %17 = arith.mulf %16, %15 : vector<8x256xf32>
    %18 = arith.maximumf %15, %17 : vector<8x256xf32>
    %19 = arith.truncf %18 : vector<8x256xf32> to vector<8x256xbf16>
    %c0_14 = arith.constant 0 : index
    %c0_15 = arith.constant 0 : index
    %20 = vector.load %arg7[%c0_14, %c0_15] : memref<256x256xbf16, #tpu.memory_space<vmem>>, vector<256x256xbf16>
    %cst_16 = arith.constant dense<0.000000e+00> : vector<8x256xf32>
    %21 = tpu.matmul %9, %20, %cst_16 {dimension_numbers = #tpu.dot_dimension_numbers<[1], [0], [0], [1], [0, 0, 1, 1], [], []>} : vector<8x256xbf16>, vector<256x256xbf16>, vector<8x256xf32> -> vector<8x256xf32>
    %c0_17 = arith.constant 0 : index
    %c0_18 = arith.constant 0 : index
    %22 = vector.load %arg8[%c0_17, %c0_18] : memref<256x256xbf16, #tpu.memory_space<vmem>>, vector<256x256xbf16>
    %cst_19 = arith.constant dense<0.000000e+00> : vector<8x256xf32>
    %23 = tpu.matmul %19, %22, %cst_19 {dimension_numbers = #tpu.dot_dimension_numbers<[1], [0], [0], [1], [0, 0, 1, 1], [], []>} : vector<8x256xbf16>, vector<256x256xbf16>, vector<8x256xf32> -> vector<8x256xf32>
    %24 = arith.addf %21, %23 : vector<8x256xf32>
    %c0_20 = arith.constant 0 : index
    %c0_21 = arith.constant 0 : index
    %25 = vector.load %arg9[%c0_20, %c0_21] : memref<1x256xf32, #tpu.memory_space<vmem>>, vector<1x256xf32>
    %26 = vector.broadcast %25 : vector<1x256xf32> to vector<8x256xf32>
    %27 = arith.addf %24, %26 : vector<8x256xf32>
    %cst_22 = arith.constant 0.00999999977 : f32
    %28 = vector.broadcast %cst_22 : f32 to vector<8x256xf32>
    %29 = arith.mulf %28, %27 : vector<8x256xf32>
    %30 = arith.maximumf %27, %29 : vector<8x256xf32>
    %31 = arith.truncf %30 : vector<8x256xf32> to vector<8x256xbf16>
    %c0_23 = arith.constant 0 : index
    %c0_24 = arith.constant 0 : index
    %32 = vector.load %arg10[%c0_23, %c0_24] : memref<256x128xbf16, #tpu.memory_space<vmem>>, vector<256x128xbf16>
    %cst_25 = arith.constant dense<0.000000e+00> : vector<8x128xf32>
    %33 = tpu.matmul %31, %32, %cst_25 {dimension_numbers = #tpu.dot_dimension_numbers<[1], [0], [0], [1], [0, 0, 1, 1], [], []>} : vector<8x256xbf16>, vector<256x128xbf16>, vector<8x128xf32> -> vector<8x128xf32>
    %c0_26 = arith.constant 0 : index
    %c0_27 = arith.constant 0 : index
    %34 = vector.load %arg11[%c0_26, %c0_27] : memref<1x128xf32, #tpu.memory_space<vmem>>, vector<1x128xf32>
    %35 = vector.broadcast %34 : vector<1x128xf32> to vector<8x128xf32>
    %36 = arith.addf %33, %35 : vector<8x128xf32>
    %cst_28 = arith.constant 0.00999999977 : f32
    %37 = vector.broadcast %cst_28 : f32 to vector<8x128xf32>
    %38 = arith.mulf %37, %36 : vector<8x128xf32>
    %39 = arith.maximumf %36, %38 : vector<8x128xf32>
    %40 = arith.truncf %39 : vector<8x128xf32> to vector<8x128xbf16>
    %c0_29 = arith.constant 0 : index
    %c0_30 = arith.constant 0 : index
    %41 = vector.load %arg12[%c0_29, %c0_30] : memref<128x256xbf16, #tpu.memory_space<vmem>>, vector<128x256xbf16>
    %cst_31 = arith.constant dense<0.000000e+00> : vector<8x256xf32>
    %42 = tpu.matmul %40, %41, %cst_31 {dimension_numbers = #tpu.dot_dimension_numbers<[1], [0], [0], [1], [0, 0, 1, 1], [], []>} : vector<8x128xbf16>, vector<128x256xbf16>, vector<8x256xf32> -> vector<8x256xf32>
    %c0_32 = arith.constant 0 : index
    %c0_33 = arith.constant 0 : index
    %43 = vector.load %arg13[%c0_32, %c0_33] : memref<1x256xf32, #tpu.memory_space<vmem>>, vector<1x256xf32>
    %44 = vector.broadcast %43 : vector<1x256xf32> to vector<8x256xf32>
    %45 = arith.addf %42, %44 : vector<8x256xf32>
    %cst_34 = arith.constant 0.00999999977 : f32
    %46 = vector.broadcast %cst_34 : f32 to vector<8x256xf32>
    %47 = arith.mulf %46, %45 : vector<8x256xf32>
    %48 = arith.maximumf %45, %47 : vector<8x256xf32>
    %49 = arith.truncf %48 : vector<8x256xf32> to vector<8x256xbf16>
    %c0_35 = arith.constant 0 : index
    %c0_36 = arith.constant 0 : index
    %50 = vector.load %arg14[%c0_35, %c0_36] : memref<256x128xbf16, #tpu.memory_space<vmem>>, vector<256x128xbf16>
    %cst_37 = arith.constant dense<0.000000e+00> : vector<8x128xf32>
    %51 = tpu.matmul %49, %50, %cst_37 {dimension_numbers = #tpu.dot_dimension_numbers<[1], [0], [0], [1], [0, 0, 1, 1], [], []>} : vector<8x256xbf16>, vector<256x128xbf16>, vector<8x128xf32> -> vector<8x128xf32>
    %c0_38 = arith.constant 0 : index
    %c0_39 = arith.constant 0 : index
    %52 = vector.load %arg15[%c0_38, %c0_39] : memref<1x128xf32, #tpu.memory_space<vmem>>, vector<1x128xf32>
    %53 = vector.broadcast %52 : vector<1x128xf32> to vector<8x128xf32>
    %54 = arith.addf %51, %53 : vector<8x128xf32>
    %cst_40 = arith.constant 0.00999999977 : f32
    %55 = vector.broadcast %cst_40 : f32 to vector<8x128xf32>
    %56 = arith.mulf %55, %54 : vector<8x128xf32>
    %57 = arith.maximumf %54, %56 : vector<8x128xf32>
    %58 = arith.truncf %57 : vector<8x128xf32> to vector<8x128xbf16>
    %c0_41 = arith.constant 0 : index
    %c0_42 = arith.constant 0 : index
    %59 = vector.load %arg16[%c0_41, %c0_42] : memref<128x96xbf16, #tpu.memory_space<vmem>>, vector<128x96xbf16>
    %cst_43 = arith.constant dense<0.000000e+00> : vector<8x96xf32>
    %60 = tpu.matmul %58, %59, %cst_43 {dimension_numbers = #tpu.dot_dimension_numbers<[1], [0], [0], [1], [0, 0, 1, 1], [], []>} : vector<8x128xbf16>, vector<128x96xbf16>, vector<8x96xf32> -> vector<8x96xf32>
    %c0_44 = arith.constant 0 : index
    %c0_45 = arith.constant 0 : index
    %61 = vector.load %arg17[%c0_44, %c0_45] : memref<1x96xf32, #tpu.memory_space<vmem>>, vector<1x96xf32>
    %62 = vector.broadcast %61 : vector<1x96xf32> to vector<8x96xf32>
    %63 = arith.addf %60, %62 : vector<8x96xf32>
    %cst_46 = arith.constant 0.00999999977 : f32
    %64 = vector.broadcast %cst_46 : f32 to vector<8x96xf32>
    %65 = arith.mulf %64, %63 : vector<8x96xf32>
    %66 = arith.maximumf %63, %65 : vector<8x96xf32>
    %67 = arith.truncf %66 : vector<8x96xf32> to vector<8x96xbf16>
    %c0_47 = arith.constant 0 : index
    %c0_48 = arith.constant 0 : index
    %68 = vector.load %arg18[%c0_47, %c0_48] : memref<96x48xbf16, #tpu.memory_space<vmem>>, vector<96x48xbf16>
    %cst_49 = arith.constant dense<0.000000e+00> : vector<8x48xf32>
    %69 = tpu.matmul %67, %68, %cst_49 {dimension_numbers = #tpu.dot_dimension_numbers<[1], [0], [0], [1], [0, 0, 1, 1], [], []>} : vector<8x96xbf16>, vector<96x48xbf16>, vector<8x48xf32> -> vector<8x48xf32>
    %c0_50 = arith.constant 0 : index
    %c0_51 = arith.constant 0 : index
    %70 = vector.load %arg19[%c0_50, %c0_51] : memref<1x48xf32, #tpu.memory_space<vmem>>, vector<1x48xf32>
    %71 = vector.broadcast %70 : vector<1x48xf32> to vector<8x48xf32>
    %72 = arith.addf %69, %71 : vector<8x48xf32>
    %cst_52 = arith.constant 0.00999999977 : f32
    %73 = vector.broadcast %cst_52 : f32 to vector<8x48xf32>
    %74 = arith.mulf %73, %72 : vector<8x48xf32>
    %75 = arith.maximumf %72, %74 : vector<8x48xf32>
    %76 = arith.truncf %75 : vector<8x48xf32> to vector<8x48xbf16>
    %c0_53 = arith.constant 0 : index
    %c0_54 = arith.constant 0 : index
    %77 = vector.load %arg20[%c0_53, %c0_54] : memref<48x128xbf16, #tpu.memory_space<vmem>>, vector<48x128xbf16>
    %cst_55 = arith.constant dense<0.000000e+00> : vector<8x128xf32>
    %78 = tpu.matmul %76, %77, %cst_55 {dimension_numbers = #tpu.dot_dimension_numbers<[1], [0], [0], [1], [0, 0, 1, 1], [], []>} : vector<8x48xbf16>, vector<48x128xbf16>, vector<8x128xf32> -> vector<8x128xf32>
    %c0_56 = arith.constant 0 : index
    %c0_57 = arith.constant 0 : index
    %79 = vector.load %arg21[%c0_56, %c0_57] : memref<1x128xf32, #tpu.memory_space<vmem>>, vector<1x128xf32>
    %80 = vector.broadcast %79 : vector<1x128xf32> to vector<8x128xf32>
    %81 = arith.addf %78, %80 : vector<8x128xf32>
    %c0_58 = arith.constant 0 : index
    %c0_59 = arith.constant 0 : index
    %82 = vector.load %arg22[%c0_58, %c0_59] : memref<8x128xf32, #tpu.memory_space<vmem>>, vector<8x128xf32>
    tpu.vector_store %arg22[%c0_58, %c0_59], %81 {strides = array<i32>} : memref<8x128xf32, #tpu.memory_space<vmem>>, vector<8x128xf32>,
    return
  }
  func.func @transform_0(%arg0: i32) -> (i32, i32) {
    %c0_i32 = arith.constant 0 : i32
    %c0_i32_0 = arith.constant 0 : i32
    return %arg0, %c0_i32 : i32, i32
  }
  func.func @transform_1(%arg0: i32) -> (i32, i32) {
    %c0_i32 = arith.constant 0 : i32
    %c0_i32_0 = arith.constant 0 : i32
    return %arg0, %c0_i32 : i32, i32
  }
  func.func @transform_2(%arg0: i32) -> (i32, i32) {
    %c0_i32 = arith.constant 0 : i32
    %c0_i32_0 = arith.constant 0 : i32
    %c0_i32_1 = arith.constant 0 : i32
    return %c0_i32, %c0_i32_0 : i32, i32
  }
  func.func @transform_3(%arg0: i32) -> (i32, i32) {
    %c0_i32 = arith.constant 0 : i32
    %c0_i32_0 = arith.constant 0 : i32
    %c0_i32_1 = arith.constant 0 : i32
    return %c0_i32, %c0_i32_0 : i32, i32
  }
  func.func @transform_4(%arg0: i32) -> (i32, i32) {
    %c0_i32 = arith.constant 0 : i32
    %c0_i32_0 = arith.constant 0 : i32
    %c0_i32_1 = arith.constant 0 : i32
    return %c0_i32, %c0_i32_0 : i32, i32
  }
  func.func @transform_5(%arg0: i32) -> (i32, i32) {
    %c0_i32 = arith.constant 0 : i32
    %c0_i32_0 = arith.constant 0 : i32
    %c0_i32_1 = arith.constant 0 : i32
    return %c0_i32, %c0_i32_0 : i32, i32
  }
  func.func @transform_6(%arg0: i32) -> (i32, i32) {
    %c0_i32 = arith.constant 0 : i32
    %c0_i32_0 = arith.constant 0 : i32
    %c0_i32_1 = arith.constant 0 : i32
    return %c0_i32, %c0_i32_0 : i32, i32
  }
  func.func @transform_7(%arg0: i32) -> (i32, i32) {
    %c0_i32 = arith.constant 0 : i32
    %c0_i32_0 = arith.constant 0 : i32
    %c0_i32_1 = arith.constant 0 : i32
    return %c0_i32, %c0_i32_0 : i32, i32
  }
  func.func @transform_8(%arg0: i32) -> (i32, i32) {
    %c0_i32 = arith.constant 0 : i32
    %c0_i32_0 = arith.constant 0 : i32
    %c0_i32_1 = arith.constant 0 : i32
    return %c0_i32, %c0_i32_0 : i32, i32
  }
  func.func @transform_9(%arg0: i32) -> (i32, i32) {
    %c0_i32 = arith.constant 0 : i32
    %c0_i32_0 = arith.constant 0 : i32
    %c0_i32_1 = arith.constant 0 : i32
    return %c0_i32, %c0_i32_0 : i32, i32
  }
  func.func @transform_10(%arg0: i32) -> (i32, i32) {
    %c0_i32 = arith.constant 0 : i32
    %c0_i32_0 = arith.constant 0 : i32
    %c0_i32_1 = arith.constant 0 : i32
    return %c0_i32, %c0_i32_0 : i32, i32
  }
  func.func @transform_11(%arg0: i32) -> (i32, i32) {
    %c0_i32 = arith.constant 0 : i32
    %c0_i32_0 = arith.constant 0 : i32
    %c0_i32_1 = arith.constant 0 : i32
    return %c0_i32, %c0_i32_0 : i32, i32
  }
  func.func @transform_12(%arg0: i32) -> (i32, i32) {
    %c0_i32 = arith.constant 0 : i32
    %c0_i32_0 = arith.constant 0 : i32
    %c0_i32_1 = arith.constant 0 : i32
    return %c0_i32, %c0_i32_0 : i32, i32
  }
  func.func @transform_13(%arg0: i32) -> (i32, i32) {
    %c0_i32 = arith.constant 0 : i32
    %c0_i32_0 = arith.constant 0 : i32
    %c0_i32_1 = arith.constant 0 : i32
    return %c0_i32, %c0_i32_0 : i32, i32
  }
  func.func @transform_14(%arg0: i32) -> (i32, i32) {
    %c0_i32 = arith.constant 0 : i32
    %c0_i32_0 = arith.constant 0 : i32
    %c0_i32_1 = arith.constant 0 : i32
    return %c0_i32, %c0_i32_0 : i32, i32
  }
  func.func @transform_15(%arg0: i32) -> (i32, i32) {
    %c0_i32 = arith.constant 0 : i32
    %c0_i32_0 = arith.constant 0 : i32
    %c0_i32_1 = arith.constant 0 : i32
    return %c0_i32, %c0_i32_0 : i32, i32
  }
  func.func @transform_16(%arg0: i32) -> (i32, i32) {
    %c0_i32 = arith.constant 0 : i32
    %c0_i32_0 = arith.constant 0 : i32
    %c0_i32_1 = arith.constant 0 : i32
    return %c0_i32, %c0_i32_0 : i32, i32
  }
  func.func @transform_17(%arg0: i32) -> (i32, i32) {
    %c0_i32 = arith.constant 0 : i32
    %c0_i32_0 = arith.constant 0 : i32
    %c0_i32_1 = arith.constant 0 : i32
    return %c0_i32, %c0_i32_0 : i32, i32
  }
  func.func @transform_18(%arg0: i32) -> (i32, i32) {
    %c0_i32 = arith.constant 0 : i32
    %c0_i32_0 = arith.constant 0 : i32
    %c0_i32_1 = arith.constant 0 : i32
    return %c0_i32, %c0_i32_0 : i32, i32
  }
  func.func @transform_19(%arg0: i32) -> (i32, i32) {
    %c0_i32 = arith.constant 0 : i32
    %c0_i32_0 = arith.constant 0 : i32
    %c0_i32_1 = arith.constant 0 : i32
    return %c0_i32, %c0_i32_0 : i32, i32
  }
  func.func @transform_20(%arg0: i32) -> (i32, i32) {
    %c0_i32 = arith.constant 0 : i32
    %c0_i32_0 = arith.constant 0 : i32
    %c0_i32_1 = arith.constant 0 : i32
    return %c0_i32, %c0_i32_0 : i32, i32
  }
  func.func @transform_21(%arg0: i32) -> (i32, i32) {
    %c0_i32 = arith.constant 0 : i32
    %c0_i32_0 = arith.constant 0 : i32
    return %arg0, %c0_i32 : i32, i32
  }
}

</mosaic_0001>

<bundles_post_ra>
// kernel: tpu_custom_call.1
= control target key start
LH: loop header
LB: loop body
LE: loop exit
PB: predicated region body
PF: predicated region fallthrough
CT: control target
= control target key end

     0   :  { %s5459_s0 = inlined_call_operand.hbm [shape: bf16[8,512], index: 0, kind: input, shape index: {}]   ;;  %s5460_s1 = inlined_call_operand.hbm [shape: bf16[8,1024], index: 1, kind: input, shape index: {}]   ;;  %s5461_s2 = inlined_call_operand.hbm [shape: bf16[512,256], index: 2, kind: input, shape index: {}]   ;;  %s5462_s3 = inlined_call_operand.hbm [shape: f32[1,256], index: 3, kind: input, shape index: {}]   ;;  %s5463_s4 = inlined_call_operand.hbm [shape: bf16[1024,256], index: 4, kind: input, shape index: {}]   ;;  %s5464_s5 = inlined_call_operand.hbm [shape: f32[1,256], index: 5, kind: input, shape index: {}]   ;;  %s5465_s6 = inlined_call_operand.hbm [shape: bf16[256,256], index: 6, kind: input, shape index: {}]   ;;  %s5466_s7 = inlined_call_operand.hbm [shape: bf16[256,256], index: 7, kind: input, shape index: {}]   ;;  %s5467_s8 = inlined_call_operand.hbm [shape: f32[1,256], index: 8, kind: input, shape index: {}]   ;;  %s5468_s9 = inlined_call_operand.vmem [shape: bf16[256,128], index: 9, kind: input, shape index: {}]   ;;  %s5469_s10 = inlined_call_operand.vmem [shape: f32[1,128], index: 10, kind: input, shape index: {}]   ;;  %s5470_s11 = inlined_call_operand.hbm [shape: bf16[128,256], index: 11, kind: input, shape index: {}]   ;;  %s5471_s12 = inlined_call_operand.hbm [shape: f32[1,256], index: 12, kind: input, shape index: {}]   ;;  %s5472_s13 = inlined_call_operand.hbm [shape: bf16[256,128], index: 13, kind: input, shape index: {}]   ;;  %s5473_s14 = inlined_call_operand.hbm [shape: f32[1,128], index: 14, kind: input, shape index: {}]   ;;  %s5474_s15 = inlined_call_operand.vmem [shape: bf16[128,96], index: 15, kind: input, shape index: {}]   ;;  %s5475_s16 = inlined_call_operand.hbm [shape: f32[1,96], index: 16, kind: input, shape index: {}]   ;;  %s5476_s17 = inlined_call_operand.vmem [shape: bf16[96,48], index: 17, kind: input, shape index: {}]   ;;  %s5477_s18 = inlined_call_operand.hbm [shape: f32[1,48], index: 18, kind: input, shape index: {}]   ;;  %s5478_s19 = inlined_call_operand.vmem [shape: bf16[48,128], index: 19, kind: input, shape index: {}]   ;;  %s5479_s20 = inlined_call_operand.hbm [shape: f32[1,128], index: 20, kind: input, shape index: {}]   ;;  %s5480_s21 = inlined_call_operand.hbm [shape: f32[8,128], index: 21, kind: output, shape index: {}]  }
   0x1   :  { %5482 = sst [smem:[#allocation39_spill]] %s5459_s0 }
   0x2   :  { %5483 = sst [smem:[#allocation40_spill]] %s5460_s1 }
   0x3   :  { %5484 = sst [smem:[#allocation41_spill]] %s5461_s2 }
   0x4   :  { %5485 = sst [smem:[#allocation42_spill]] %s5462_s3 }
   0x5   :  { %5486 = sst [smem:[#allocation43_spill]] %s5463_s4 }
   0x6   :  { %5487 = sst [smem:[#allocation44_spill]] %s5464_s5 }
   0x7   :  { %5488 = sst [smem:[#allocation45_spill]] %s5478_s19 }
   0x8   :  { %5489 = sst [smem:[#allocation46_spill]] %s5480_s21 }
   0x9   :  { %26 = vsyncpa [#allocation3], 0 }
   0xa   :  { %27 = vsyncpa [#allocation6], 0 }
   0xb   :  { %28 = vsyncpa [#allocation9], 0 }
   0xc   :  { %29 = vsyncpa [#allocation12], 0 }
   0xd   :  { %30 = vsyncpa [#allocation15], 0 }
   0xe   :  { %31 = vsyncpa [#allocation18], 0 }
   0xf   :  { %32 = vsyncpa [#allocation21], 0 }
  0x10   :  { %33 = vsyncpa [#allocation24], 0 }
  0x11   :  { %34 = vsyncpa [#allocation27], 0  ;;  %s5490_s26 = sld [smem:[#allocation40_spill]] }
  0x17   :  { %s52_s27 = sshll.u32 %s5490_s26, 4  ;;  %s53_s27 = int_to_ptr.hbm [resolvable:$true] %s52_s27 }
  0x18   :  { %35 = vsyncpa [#allocation4], 0  ;;  %s5081_s3 = smov [#allocation5]   ;;  %s5491_s4 = sld [smem:[#allocation42_spill]] }
  0x19   :  { %s54_s28 = sshll.u32 %s5081_s3, 4  ;;  %s5082_s5 = smov [#allocation8]   ;;  %s55_s28 = int_to_ptr.vmem [resolvable:$true] %s54_s28 }
  0x1a   :  { %57 = dma.hbm_to_vmem [thread:$0]  %s53_s27, 512, %s55_s28, [#allocation6]  }
  0x1b   :  { %s78_s22 = sshll.u32 %s5082_s5, 4  ;;  %s5492_s24 = sld [smem:[#allocation44_spill]]  ;;  %s79_s22 = int_to_ptr.vmem [resolvable:$true] %s78_s22 }
  0x1c   :  { %s5083_s2 = smov [#allocation11]   ;;  %s123_s19 = sshll.u32 %s5466_s7, 4  ;;  %s124_s19 = int_to_ptr.hbm [resolvable:$true] %s123_s19 }
  0x1d   :  { %s102_s25 = sshll.u32 %s5083_s2, 4  ;;  %s5084_s27 = smov [#allocation14]   ;;  %s103_s25 = int_to_ptr.vmem [resolvable:$true] %s102_s25 }
  0x1e   :  { %s76_s30 = sshll.u32 %s5491_s4, 4  ;;  %s125_s28 = sshll.u32 %s5084_s27, 4  ;;  %s77_s30 = int_to_ptr.hbm [resolvable:$true] %s76_s30  ;;  %s126_s28 = int_to_ptr.vmem [resolvable:$true] %s125_s28 }
  0x1f   :  { %81 = dma.hbm_to_vmem [thread:$0]  %s77_s30, 32, %s79_s22, [#allocation9]  }
  0x20   :  { %s151_s4 = sshll.u32 %s5470_s11, 4  ;;  %s5085_s5 = smov 128   ;;  %s152_s4 = int_to_ptr.hbm [resolvable:$true] %s151_s4 }
  0x21   :  { %s100_s21 = sshll.u32 %s5492_s24, 4  ;;  %s5086_s23 = smov 8   ;;  %s101_s21 = int_to_ptr.hbm [resolvable:$true] %s100_s21 }
  0x22   :  { %105 = dma.hbm_to_vmem [thread:$0]  %s101_s21, 32, %s103_s25, [#allocation12]  }
  0x23   :  { %131 = dma.hbm_to_vmem [thread:$0]  %s124_s19, 4096, %s126_s28, [#allocation15], %s5085_s5, %s5085_s5, %s5086_s23  }
  0x24   :  { %s175_s7 = sshll.u32 %s5472_s13, 4  ;;  %s5087_s21 = smov [#allocation17]   ;;  %s176_s7 = int_to_ptr.hbm [resolvable:$true] %s175_s7 }
  0x25   :  { %s153_s1 = sshll.u32 %s5087_s21, 4  ;;  %s5088_s11 = smov [#allocation20]   ;;  %s154_s1 = int_to_ptr.vmem [resolvable:$true] %s153_s1 }
  0x26   :  { %159 = dma.hbm_to_vmem [thread:$0]  %s152_s4, 2048, %s154_s1, [#allocation18], %s5085_s5, %s5085_s5, %s5086_s23  }
  0x27   :  { %s177_s24 = sshll.u32 %s5088_s11, 4  ;;  %s5089_s2 = smov 64   ;;  %s178_s24 = int_to_ptr.vmem [resolvable:$true] %s177_s24 }
  0x28   :  { %s5090_s25 = smov 4   ;;  %s202_s3 = sshll.u32 %s5475_s16, 4  ;;  %s203_s3 = int_to_ptr.hbm [resolvable:$true] %s202_s3 }
  0x29   :  { %183 = dma.hbm_to_vmem [thread:$0]  %s176_s7, 2048, %s178_s24, [#allocation21], %s5089_s2, %s5089_s2, %s5090_s25  }
  0x2a   :  { %s5091_s13 = smov [#allocation23]   ;;  %s5493_s0 = sld [smem:[#allocation39_spill]] }
  0x2b   :  { %s204_s27 = sshll.u32 %s5091_s13, 4  ;;  %s5092_s4 = smov [#allocation2]   ;;  %s205_s27 = int_to_ptr.vmem [resolvable:$true] %s204_s27 }
  0x2c   :  { %207 = dma.hbm_to_vmem [thread:$0]  %s203_s3, 16, %s205_s27, [#allocation24]  }
  0x2d   :  { %s43_s22 = sshll.u32 %s5092_s4, 4  ;;  %s5494_s11 = sld [smem:[#allocation41_spill]]  ;;  %s44_s22 = int_to_ptr.vmem [resolvable:$true] %s43_s22 }
  0x2e   :  { %s5495_s2 = sld [smem:[#allocation43_spill]]  ;;  %s5093_s26 = smov [#allocation7]  }
  0x2f   :  { %s64_s19 = sshll.u32 %s5093_s26, 4  ;;  %s5094_s3 = smov [#allocation10]   ;;  %s65_s19 = int_to_ptr.vmem [resolvable:$true] %s64_s19 }
  0x30   :  { %s41_s30 = sshll.u32 %s5493_s0, 4  ;;  %s88_s13 = sshll.u32 %s5094_s3, 4  ;;  %s42_s30 = int_to_ptr.hbm [resolvable:$true] %s41_s30  ;;  %s89_s13 = int_to_ptr.vmem [resolvable:$true] %s88_s13 }
  0x31   :  { %46 = dma.hbm_to_vmem [thread:$0]  %s42_s30, 256, %s44_s22, [#allocation3]  }
  0x32   :  { %s110_s29 = sshll.u32 %s5465_s6, 4  ;;  %s137_s4 = sshll.u32 %s5467_s8, 4  ;;  %s111_s29 = int_to_ptr.hbm [resolvable:$true] %s110_s29  ;;  %s138_s4 = int_to_ptr.hbm [resolvable:$true] %s137_s4 }
  0x33   :  { %s62_s7 = sshll.u32 %s5494_s11, 4  ;;  %s5095_s22 = smov [#allocation13]   ;;  %s63_s7 = int_to_ptr.hbm [resolvable:$true] %s62_s7 }
  0x34   :  { %s86_s25 = sshll.u32 %s5495_s2, 4  ;;  %s112_s21 = sshll.u32 %s5095_s22, 4  ;;  %s87_s25 = int_to_ptr.hbm [resolvable:$true] %s86_s25  ;;  %s113_s21 = int_to_ptr.vmem [resolvable:$true] %s112_s21 }
  0x35   :  { %70 = dma.hbm_to_vmem [thread:$0]  %s63_s7, 8192, %s65_s19, [#allocation6], %s5085_s5, %s5085_s5, %s5086_s23  }
  0x36   :  { %94 = dma.hbm_to_vmem [thread:$0]  %s87_s25, 16384, %s89_s13, [#allocation9], %s5085_s5, %s5085_s5, %s5086_s23  }
  0x37   :  { %118 = dma.hbm_to_vmem [thread:$0]  %s111_s29, 4096, %s113_s21, [#allocation12], %s5085_s5, %s5085_s5, %s5086_s23  }
  0x38   :  { %s5096_s1 = smov [#allocation16]   ;;  %s165_s16 = sshll.u32 %s5471_s12, 4  ;;  %s166_s16 = int_to_ptr.hbm [resolvable:$true] %s165_s16 }
  0x39   :  { %s139_s6 = sshll.u32 %s5096_s1, 4  ;;  %s189_s8 = sshll.u32 %s5473_s14, 4  ;;  %s140_s6 = int_to_ptr.vmem [resolvable:$true] %s139_s6  ;;  %s190_s8 = int_to_ptr.hbm [resolvable:$true] %s189_s8 }
  0x3a   :  { %142 = dma.hbm_to_vmem [thread:$0]  %s138_s4, 32, %s140_s6, [#allocation15]  }
  0x3b   :  { %s5097_s25 = smov [#allocation19]   ;;  %s5098_s19 = smov [#allocation22]  }
  0x3c   :  { %s167_s26 = sshll.u32 %s5097_s25, 4  ;;  %s191_s5 = sshll.u32 %s5098_s19, 4  ;;  %s168_s26 = int_to_ptr.vmem [resolvable:$true] %s167_s26  ;;  %s192_s5 = int_to_ptr.vmem [resolvable:$true] %s191_s5 }
  0x3d   :  { %170 = dma.hbm_to_vmem [thread:$0]  %s166_s16, 32, %s168_s26, [#allocation18]  }
  0x3e   :  { %s215_s13 = sshll.u32 %s5477_s18, 4  ;;  %s228_s28 = sshll.u32 %s5479_s20, 4  ;;  %s216_s13 = int_to_ptr.hbm [resolvable:$true] %s215_s13  ;;  %s229_s28 = int_to_ptr.hbm [resolvable:$true] %s228_s28 }
  0x3f   :  { %194 = dma.hbm_to_vmem [thread:$0]  %s190_s8, 16, %s192_s5, [#allocation21]  }
  0x40   :  { %s5099_s29 = smov [#allocation25]   ;;  %s5100_s0 = smov [#allocation26]  }
  0x41   :  { %s217_s14 = sshll.u32 %s5099_s29, 4  ;;  %s230_s30 = sshll.u32 %s5100_s0, 4  ;;  %s218_s14 = int_to_ptr.vmem [resolvable:$true] %s217_s14  ;;  %s231_s30 = int_to_ptr.vmem [resolvable:$true] %s230_s30 }
  0x42   :  { %220 = dma.hbm_to_vmem [thread:$0]  %s216_s13, 16, %s218_s14, [#allocation24]  }
  0x43   :  { %233 = dma.hbm_to_vmem [thread:$0]  %s229_s28, 16, %s231_s30, [#allocation27]  }
  0x44   :  { %5061 = dma.done.wait [#allocation3], 256  }
  0x45   :  { %5062 = vsyncadd [#allocation3], 4294967040 }
  0x46   :  { %5063 = dma.done.wait [#allocation6], 8704  }
  0x47   :  { %5064 = vsyncadd [#allocation6], 4294958592 }
  0x48   :  { %5065 = dma.done.wait [#allocation9], 16416  }
  0x49   :  { %5066 = vsyncadd [#allocation9], 4294950880 }
  0x4a   :  { %5067 = dma.done.wait [#allocation12], 4128  }
  0x4b   :  { %5068 = vsyncadd [#allocation12], 4294963168 }
  0x4c   :  { %5069 = dma.done.wait [#allocation15], 4128  }
  0x4d   :  { %5070 = vsyncadd [#allocation15], 4294963168 }
  0x4e   :  { %5071 = dma.done.wait [#allocation18], 2080  }
  0x4f   :  { %5072 = vsyncadd [#allocation18], 4294965216 }
  0x50   :  { %5073 = dma.done.wait [#allocation21], 2064  }
  0x51   :  { %5074 = vsyncadd [#allocation21], 4294965232 }
  0x52   :  { %5075 = dma.done.wait [#allocation24], 32  }
  0x53   :  { %5076 = vsyncadd [#allocation24], 4294967264 }
  0x54   :  { %5077 = dma.done.wait [#allocation27], 16  }
  0x55   :  { %5078 = vsyncadd [#allocation27], 4294967280  ;;  %v3078_v0 = vld [vmem:[#allocation7 + $0x70] sm:$0xf]  ;;  %v4321_v1 = vld [vmem:[#allocation7 + $0x74] sm:$0xf0] }
  0x56   :  { %v3142_v2 = vld [vmem:[#allocation7 + $0xf0] sm:$0xf]  ;;  %v3079_v3 = vor.u32 %v4321_v1, %v3078_v0  ;;  %v4337_v4 = vld [vmem:[#allocation7 + $0xf4] sm:$0xf0]  ;;  %v3070_v11 = vld [vmem:[#allocation7 + $0x60] sm:$0xf] }
  0x57   :  { %v3206_v5 = vld [vmem:[#allocation7 + $0x170] sm:$0xf]  ;;  %v4353_v6 = vld [vmem:[#allocation7 + $0x174] sm:$0xf0]  ;;  %v3143_v7 = vor.u32 %v4337_v4, %v3142_v2  ;;  %v4319_v13 = vld [vmem:[#allocation7 + $0x64] sm:$0xf0] }
  0x58   :  { %v3207_v8 = vor.u32 %v4353_v6, %v3206_v5  ;;  %v3270_v9 = vld [vmem:[#allocation7 + $0x1f0] sm:$0xf]  ;;  %v4369_v10 = vld [vmem:[#allocation7 + $0x1f4] sm:$0xf0]  ;;  %705 = vmatpush.bf16.msra.mxu0 %v3079_v3  ;;  %v3134_v14 = vld [vmem:[#allocation7 + $0xe0] sm:$0xf]  ;;  %v3071_v16 = vor.u32 %v4319_v13, %v3070_v11 }
  0x59   :  { %v3271_v12 = vor.u32 %v4369_v10, %v3270_v9  ;;  %v4335_v15 = vld [vmem:[#allocation7 + $0xe4] sm:$0xf0]  ;;  %718 = vmatpush.bf16.msra.mxu1 %v3143_v7  ;;  %v3198_v18 = vld [vmem:[#allocation7 + $0x160] sm:$0xf]  ;;  %v3062_v23 = vld [vmem:[#allocation7 + $0x50] sm:$0xf] }
  0x5a   :  { %731 = vmatpush.bf16.msra.mxu2 %v3207_v8  ;;  %v3135_v17 = vor.u32 %v4335_v15, %v3134_v14  ;;  %v4351_v19 = vld [vmem:[#allocation7 + $0x164] sm:$0xf0]  ;;  %v3262_v20 = vld [vmem:[#allocation7 + $0x1e0] sm:$0xf]  ;;  %v4317_v24 = vld [vmem:[#allocation7 + $0x54] sm:$0xf0] }
  0x5b   :  { %744 = vmatpush.bf16.msra.mxu3 %v3271_v12  ;;  %v3199_v21 = vor.u32 %v4351_v19, %v3198_v18  ;;  %v4367_v22 = vld [vmem:[#allocation7 + $0x1e4] sm:$0xf0]  ;;  %v3126_v26 = vld [vmem:[#allocation7 + $0xd0] sm:$0xf]  ;;  %v4333_v27 = vld [vmem:[#allocation7 + $0xd4] sm:$0xf0]  ;;  %v3063_v29 = vor.u32 %v4317_v24, %v3062_v23 }
  0x5c   :  { %v3263_v25 = vor.u32 %v4367_v22, %v3262_v20  ;;  %v3190_v28 = vld [vmem:[#allocation7 + $0x150] sm:$0xf]  ;;  %706 = vmatpush.bf16.msra.mxu0 %v3071_v16  ;;  %v4349_v30 = vld [vmem:[#allocation7 + $0x154] sm:$0xf0]  ;;  %v3127_v33 = vor.u32 %v4333_v27, %v3126_v26  ;;  %v3054_v35 = vld [vmem:[#allocation7 + $0x40] sm:$0xf] }
  0x5d   :  { %v3254_v31 = vld [vmem:[#allocation7 + $0x1d0] sm:$0xf]  ;;  %v4365_v32 = vld [vmem:[#allocation7 + $0x1d4] sm:$0xf0]  ;;  %719 = vmatpush.bf16.msra.mxu1 %v3135_v17  ;;  %v3191_v34 = vor.u32 %v4349_v30, %v3190_v28  ;;  %v4315_v36 = vld [vmem:[#allocation7 + $0x44] sm:$0xf0] }
  0x5e   :  { %732 = vmatpush.bf16.msra.mxu2 %v3199_v21  ;;  %v3118_v37 = vld [vmem:[#allocation7 + $0xc0] sm:$0xf]  ;;  %v3255_v38 = vor.u32 %v4365_v32, %v3254_v31  ;;  %v4331_v39 = vld [vmem:[#allocation7 + $0xc4] sm:$0xf0]  ;;  %v3055_v44 = vor.u32 %v4315_v36, %v3054_v35  ;;  %v3046_v47 = vld [vmem:[#allocation7 + $0x30] sm:$0xf] }
  0x5f   :  { %745 = vmatpush.bf16.msra.mxu3 %v3263_v25  ;;  %v3182_v40 = vld [vmem:[#allocation7 + $0x140] sm:$0xf]  ;;  %v4347_v41 = vld [vmem:[#allocation7 + $0x144] sm:$0xf0]  ;;  %v3119_v45 = vor.u32 %v4331_v39, %v3118_v37  ;;  %v4313_v48 = vld [vmem:[#allocation7 + $0x34] sm:$0xf0] }
  0x60   :  { %v3246_v42 = vld [vmem:[#allocation7 + $0x1c0] sm:$0xf]  ;;  %v4363_v43 = vld [vmem:[#allocation7 + $0x1c4] sm:$0xf0]  ;;  %707 = vmatpush.bf16.msra.mxu0 %v3063_v29  ;;  %v3183_v46 = vor.u32 %v4347_v41, %v3182_v40  ;;  %v3110_v49 = vld [vmem:[#allocation7 + $0xb0] sm:$0xf]  ;;  %v3047_v56 = vor.u32 %v4313_v48, %v3046_v47 }
  0x61   :  { %720 = vmatpush.bf16.msra.mxu1 %v3127_v33  ;;  %v3247_v50 = vor.u32 %v4363_v43, %v3246_v42  ;;  %v4329_v51 = vld [vmem:[#allocation7 + $0xb4] sm:$0xf0]  ;;  %v3174_v52 = vld [vmem:[#allocation7 + $0x130] sm:$0xf]  ;;  %v3038_v59 = vld [vmem:[#allocation7 + $0x20] sm:$0xf] }
  0x62   :  { %733 = vmatpush.bf16.msra.mxu2 %v3191_v34  ;;  %v4345_v53 = vld [vmem:[#allocation7 + $0x134] sm:$0xf0]  ;;  %v3238_v54 = vld [vmem:[#allocation7 + $0x1b0] sm:$0xf]  ;;  %v3111_v57 = vor.u32 %v4329_v51, %v3110_v49  ;;  %v4311_v60 = vld [vmem:[#allocation7 + $0x24] sm:$0xf0] }
  0x63   :  { %746 = vmatpush.bf16.msra.mxu3 %v3255_v38  ;;  %v4361_v55 = vld [vmem:[#allocation7 + $0x1b4] sm:$0xf0]  ;;  %v3175_v58 = vor.u32 %v4345_v53, %v3174_v52  ;;  %v3102_v61 = vld [vmem:[#allocation7 + $0xa0] sm:$0xf]  ;;  %v4327_v63 = vld [vmem:[#allocation7 + $0xa4] sm:$0xf0]  ;;  %v3039_v4 = vor.u32 %v4311_v60, %v3038_v59 }
  0x64   :  { %708 = vmatpush.bf16.msra.mxu0 %v3055_v44  ;;  %v3239_v62 = vor.u32 %v4361_v55, %v3238_v54  ;;  %v3166_v0 = vld [vmem:[#allocation7 + $0x120] sm:$0xf]  ;;  %v4343_v1 = vld [vmem:[#allocation7 + $0x124] sm:$0xf0]  ;;  %v3103_v5 = vor.u32 %v4327_v63, %v3102_v61  ;;  %v3030_v7 = vld [vmem:[#allocation7 + $0x10] sm:$0xf] }
  0x65   :  { %721 = vmatpush.bf16.msra.mxu1 %v3119_v45  ;;  %v3230_v2 = vld [vmem:[#allocation7 + $0x1a0] sm:$0xf]  ;;  %v4359_v3 = vld [vmem:[#allocation7 + $0x1a4] sm:$0xf0]  ;;  %v3167_v6 = vor.u32 %v4343_v1, %v3166_v0  ;;  %v4309_v8 = vld [vmem:[#allocation7 + $0x14] sm:$0xf0] }
  0x66   :  { %734 = vmatpush.bf16.msra.mxu2 %v3183_v46  ;;  %v3094_v9 = vld [vmem:[#allocation7 + $0x90] sm:$0xf]  ;;  %v3231_v10 = vor.u32 %v4359_v3, %v3230_v2  ;;  %v4325_v11 = vld [vmem:[#allocation7 + $0x94] sm:$0xf0]  ;;  %v3031_v16 = vor.u32 %v4309_v8, %v3030_v7  ;;  %v3022_v17 = vld [vmem:[#allocation7] sm:$0xf] }
  0x67   :  { %747 = vmatpush.bf16.msra.mxu3 %v3247_v50  ;;  %v3158_v12 = vld [vmem:[#allocation7 + $0x110] sm:$0xf]  ;;  %v4341_v13 = vld [vmem:[#allocation7 + $0x114] sm:$0xf0]  ;;  %v4307_v18 = vld [vmem:[#allocation7 + $0x4] sm:$0xf0]  ;;  %v3095_v19 = vor.u32 %v4325_v11, %v3094_v9 }
  0x68   :  { %709 = vmatpush.bf16.msra.mxu0 %v3047_v56  ;;  %v3222_v14 = vld [vmem:[#allocation7 + $0x190] sm:$0xf]  ;;  %v4357_v15 = vld [vmem:[#allocation7 + $0x194] sm:$0xf0]  ;;  %v3159_v20 = vor.u32 %v4341_v13, %v3158_v12  ;;  %v3086_v21 = vld [vmem:[#allocation7 + $0x80] sm:$0xf]  ;;  %v3023_v31 = vor.u32 %v4307_v18, %v3022_v17 }
  0x69   :  { %722 = vmatpush.bf16.msra.mxu1 %v3111_v57  ;;  %v4323_v22 = vld [vmem:[#allocation7 + $0x84] sm:$0xf0]  ;;  %v3150_v23 = vld [vmem:[#allocation7 + $0x100] sm:$0xf]  ;;  %v3223_v24 = vor.u32 %v4357_v15, %v3222_v14  ;;  %v4320_v28 = vld [vmem:[#allocation7 + $0x74] sm:$0xf] }
  0x6a   :  { %735 = vmatpush.bf16.msra.mxu2 %v3175_v58  ;;  %v4339_v25 = vld [vmem:[#allocation7 + $0x104] sm:$0xf0]  ;;  %v3214_v26 = vld [vmem:[#allocation7 + $0x180] sm:$0xf]  ;;  %v3080_v29 = vld [vmem:[#allocation7 + $0x78] sm:$0xf0]  ;;  %v3087_v35 = vor.u32 %v4323_v22, %v3086_v21 }
  0x6b   :  { %748 = vmatpush.bf16.msra.mxu3 %v3239_v62  ;;  %v4355_v27 = vld [vmem:[#allocation7 + $0x184] sm:$0xf0]  ;;  %v4336_v30 = vld [vmem:[#allocation7 + $0xf4] sm:$0xf]  ;;  %v3144_v32 = vld [vmem:[#allocation7 + $0xf8] sm:$0xf0]  ;;  %v3151_v36 = vor.u32 %v4339_v25, %v3150_v23  ;;  %v3083_v40 = vor.u32 %v4320_v28, %v3080_v29 }
  0x6c   :  { %710 = vmatpush.bf16.msra.mxu0 %v3039_v4  ;;  %v4352_v33 = vld [vmem:[#allocation7 + $0x174] sm:$0xf]  ;;  %v3208_v34 = vld [vmem:[#allocation7 + $0x178] sm:$0xf0]  ;;  %v3215_v39 = vor.u32 %v4355_v27, %v3214_v26  ;;  %v3147_v41 = vor.u32 %v4336_v30, %v3144_v32  ;;  %v4318_v43 = vld [vmem:[#allocation7 + $0x64] sm:$0xf] }
  0x6d   :  { %723 = vmatpush.bf16.msra.mxu1 %v3103_v5  ;;  %v4368_v37 = vld [vmem:[#allocation7 + $0x1f4] sm:$0xf]  ;;  %v3272_v38 = vld [vmem:[#allocation7 + $0x1f8] sm:$0xf0]  ;;  %v3211_v42 = vor.u32 %v4352_v33, %v3208_v34  ;;  %v3072_v44 = vld [vmem:[#allocation7 + $0x68] sm:$0xf0] }
  0x6e   :  { %736 = vmatpush.bf16.msra.mxu2 %v3167_v6  ;;  %v4334_v45 = vld [vmem:[#allocation7 + $0xe4] sm:$0xf]  ;;  %v3275_v46 = vor.u32 %v4368_v37, %v3272_v38  ;;  %v3136_v47 = vld [vmem:[#allocation7 + $0xe8] sm:$0xf0]  ;;  %v3075_v52 = vor.u32 %v4318_v43, %v3072_v44  ;;  %v4316_v53 = vld [vmem:[#allocation7 + $0x54] sm:$0xf] }
  0x6f   :  { %749 = vmatpush.bf16.msra.mxu3 %v3231_v10  ;;  %v4350_v48 = vld [vmem:[#allocation7 + $0x164] sm:$0xf]  ;;  %v3200_v49 = vld [vmem:[#allocation7 + $0x168] sm:$0xf0]  ;;  %v3139_v54 = vor.u32 %v4334_v45, %v3136_v47  ;;  %v3064_v56 = vld [vmem:[#allocation7 + $0x58] sm:$0xf0] }
  0x70   :  { %711 = vmatpush.bf16.msra.mxu0 %v3031_v16  ;;  %v4366_v50 = vld [vmem:[#allocation7 + $0x1e4] sm:$0xf]  ;;  %v3264_v51 = vld [vmem:[#allocation7 + $0x1e8] sm:$0xf0]  ;;  %v3203_v55 = vor.u32 %v4350_v48, %v3200_v49  ;;  %v4332_v57 = vld [vmem:[#allocation7 + $0xd4] sm:$0xf]  ;;  %v3067_v0 = vor.u32 %v4316_v53, %v3064_v56 }
  0x71   :  { %724 = vmatpush.bf16.msra.mxu1 %v3095_v19  ;;  %v3128_v58 = vld [vmem:[#allocation7 + $0xd8] sm:$0xf0]  ;;  %v3267_v59 = vor.u32 %v4366_v50, %v3264_v51  ;;  %v4348_v60 = vld [vmem:[#allocation7 + $0x154] sm:$0xf]  ;;  %v4314_v5 = vld [vmem:[#allocation7 + $0x44] sm:$0xf] }
  0x72   :  { %737 = vmatpush.bf16.msra.mxu2 %v3159_v20  ;;  %v3192_v61 = vld [vmem:[#allocation7 + $0x158] sm:$0xf0]  ;;  %v4364_v62 = vld [vmem:[#allocation7 + $0x1d4] sm:$0xf]  ;;  %v3131_v1 = vor.u32 %v4332_v57, %v3128_v58  ;;  %v3056_v6 = vld [vmem:[#allocation7 + $0x48] sm:$0xf0] }
  0x73   :  { %750 = vmatpush.bf16.msra.mxu3 %v3223_v24  ;;  %v3256_v63 = vld [vmem:[#allocation7 + $0x1d8] sm:$0xf0]  ;;  %v299_v3 = vld [vmem:[#allocation2] sm:$0xff]  ;;  %v3195_v4 = vor.u32 %v4348_v60, %v3192_v61  ;;  %v4330_v7 = vld [vmem:[#allocation7 + $0xc4] sm:$0xf]  ;;  %v3059_v21 = vor.u32 %v4314_v5, %v3056_v6  ;;  %vm2929_vm0 = vcmask 785408  }
  0x74   :  { %712 = vmatpush.bf16.msra.mxu0 %v3023_v31  ;;  %v300_v2 = vld [vmem:[#allocation2 + $0x8] sm:$0xff]  ;;  %v373_v9 = vunpack.c.l.b16 %v299_v3  ;;  %v3259_v11 = vor.u32 %v4364_v62, %v3256_v63  ;;  %v3120_v12 = vld [vmem:[#allocation7 + $0xc8] sm:$0xf0]  ;;  %v4346_v13 = vld [vmem:[#allocation7 + $0x144] sm:$0xf]  ;;  %v374_v15 = vunpack.c.h.b16 %v299_v3  ;;  %vm2977_vm1 = vcmask 392192  }
  0x75   :  { %725 = vmatpush.bf16.msra.mxu1 %v3087_v35  ;;  %v375_v8 = vunpack.c.l.b16 %v300_v2  ;;  %v376_v10 = vunpack.c.h.b16 %v300_v2  ;;  %v3184_v14 = vld [vmem:[#allocation7 + $0x148] sm:$0xf0]  ;;  %v4362_v16 = vld [vmem:[#allocation7 + $0x1c4] sm:$0xf]  ;;  %v3123_v23 = vor.u32 %v4330_v7, %v3120_v12  ;;  %v4312_v25 = vld [vmem:[#allocation7 + $0x34] sm:$0xf] }
  0x76   :  { %738 = vmatpush.bf16.msra.mxu2 %v3151_v36  ;;  %v3248_v17 = vld [vmem:[#allocation7 + $0x1c8] sm:$0xf0]  ;;  %v5277_v19 = vpack.c.b16 %v373_v9, %v373_v9  ;;  %v5281_v22 = vpack.c.b16 %v374_v15, %v374_v15  ;;  %v3187_v24 = vor.u32 %v4346_v13, %v3184_v14  ;;  %v3048_v26 = vld [vmem:[#allocation7 + $0x38] sm:$0xf0]  ;;  %v4328_v27 = vld [vmem:[#allocation7 + $0xb4] sm:$0xf] }
  0x77   :  { %751 = vmatpush.bf16.msra.mxu3 %v3215_v39  ;;  %v5275_v18 = vpack.c.b16 %v375_v8, %v375_v8  ;;  %v5279_v20 = vpack.c.b16 %v376_v10, %v376_v10  ;;  %v3251_v28 = vor.u32 %v4362_v16, %v3248_v17  ;;  %v3112_v29 = vld [vmem:[#allocation7 + $0xb8] sm:$0xf0]  ;;  %v4344_v30 = vld [vmem:[#allocation7 + $0x134] sm:$0xf]  ;;  %v3051_v34 = vor.u32 %v4312_v25, %v3048_v26  ;;  %v4310_v37 = vld [vmem:[#allocation7 + $0x24] sm:$0xf] }
  0x78   :  { %757 = vmatpush.bf16.msrb.mxu0 %v3083_v40  ;;  %v3176_v31 = vld [vmem:[#allocation7 + $0x138] sm:$0xf0]  ;;  %v4360_v32 = vld [vmem:[#allocation7 + $0x1b4] sm:$0xf]  ;;  %726 = vmatmul.bf16.vlgmr.msra.gmra.mxu1 %v5281_v22  ;;  %v3115_v35 = vor.u32 %v4328_v27, %v3112_v29  ;;  %v3040_v38 = vld [vmem:[#allocation7 + $0x28] sm:$0xf0] }
  0x79   :  { %770 = vmatpush.bf16.msrb.mxu1 %v3147_v41  ;;  %739 = vmatmul.bf16.vlgmr.msra.gmra.mxu2 %v5275_v18  ;;  %v3240_v33 = vld [vmem:[#allocation7 + $0x1b8] sm:$0xf0]  ;;  %v3179_v36 = vor.u32 %v4344_v30, %v3176_v31  ;;  %v4326_v39 = vld [vmem:[#allocation7 + $0xa4] sm:$0xf]  ;;  %v3104_v41 = vld [vmem:[#allocation7 + $0xa8] sm:$0xf0] }
  0x7a   :  { %783 = vmatpush.bf16.msrb.mxu2 %v3211_v42  ;;  %713 = vmatmul.bf16.vlgmr.msra.gmra.mxu0 %v5277_v19  ;;  %v3243_v40 = vor.u32 %v4360_v32, %v3240_v33  ;;  %v4342_v42 = vld [vmem:[#allocation7 + $0x124] sm:$0xf]  ;;  %v3168_v43 = vld [vmem:[#allocation7 + $0x128] sm:$0xf0]  ;;  %v3107_v47 = vor.u32 %v4326_v39, %v3104_v41  ;;  %v4308_v49 = vld [vmem:[#allocation7 + $0x14] sm:$0xf] }
  0x7b   :  { %796 = vmatpush.bf16.msrb.mxu3 %v3275_v46  ;;  %v4358_v44 = vld [vmem:[#allocation7 + $0x1a4] sm:$0xf]  ;;  %v3232_v45 = vld [vmem:[#allocation7 + $0x1a8] sm:$0xf0]  ;;  %v3043_v46 = vor.u32 %v4310_v37, %v3040_v38  ;;  %v3171_v48 = vor.u32 %v4342_v42, %v3168_v43  ;;  %v3032_v50 = vld [vmem:[#allocation7 + $0x18] sm:$0xf0] }
  0x7c   :  { %758 = vmatpush.bf16.msrb.mxu0 %v3075_v52  ;;  %752 = vmatmul.bf16.vlgmr.msra.gmra.mxu3 %v5279_v20  ;;  %v4324_v51 = vld [vmem:[#allocation7 + $0x94] sm:$0xf]  ;;  %v3235_v52 = vor.u32 %v4358_v44, %v3232_v45  ;;  %v3096_v53 = vld [vmem:[#allocation7 + $0x98] sm:$0xf0]  ;;  %v3035_v58 = vor.u32 %v4308_v49, %v3032_v50  ;;  %v3024_v60 = vld [vmem:[#allocation7 + $0x8] sm:$0xf0] }
  0x7d   :  { %771 = vmatpush.bf16.msrb.mxu1 %v3139_v54  ;;  %v4340_v54 = vld [vmem:[#allocation7 + $0x114] sm:$0xf]  ;;  %v3224_v57 = vld [vmem:[#allocation7 + $0x198] sm:$0xf0]  ;;  %v3099_v61 = vor.u32 %v4324_v51, %v3096_v53  ;;  %v4322_v63 = vld [vmem:[#allocation7 + $0x84] sm:$0xf] }
  0x7e   :  { %784 = vmatpush.bf16.msrb.mxu2 %v3203_v55  ;;  %v3160_v55 = vld [vmem:[#allocation7 + $0x118] sm:$0xf0]  ;;  %v4356_v56 = vld [vmem:[#allocation7 + $0x194] sm:$0xf]  ;;  %v3152_v3 = vld [vmem:[#allocation7 + $0x108] sm:$0xf0] }
  0x7f   :  { %797 = vmatpush.bf16.msrb.mxu3 %v3267_v59  ;;  %v4306_v59 = vld [vmem:[#allocation7 + $0x4] sm:$0xf]  ;;  %v3163_v62 = vor.u32 %v4340_v54, %v3160_v55  ;;  %v3227_v2 = vor.u32 %v4356_v56, %v3224_v57  ;;  %v3216_v5 = vld [vmem:[#allocation7 + $0x188] sm:$0xf0]  ;;  %v3334_v6 = vld [vmem:[#allocation10 + $0x70] sm:$0xf] }
  0x80   :  { %759 = vmatpush.bf16.msrb.mxu0 %v3067_v0  ;;  %v3088_v0 = vld [vmem:[#allocation7 + $0x88] sm:$0xf0]  ;;  %v4385_v7 = vld [vmem:[#allocation10 + $0x74] sm:$0xf0]  ;;  %v3398_v8 = vld [vmem:[#allocation10 + $0xf0] sm:$0xf]  ;;  %v3027_v9 = vor.u32 %v4306_v59, %v3024_v60 }
  0x81   :  { %772 = vmatpush.bf16.msrb.mxu1 %v3131_v1  ;;  %v4338_v1 = vld [vmem:[#allocation7 + $0x104] sm:$0xf]  ;;  %v4401_v10 = vld [vmem:[#allocation10 + $0xf4] sm:$0xf0]  ;;  %v3091_v13 = vor.u32 %v4322_v63, %v3088_v0  ;;  %v3526_v15 = vld [vmem:[#allocation10 + $0x1f0] sm:$0xf] }
  0x82   :  { %785 = vmatpush.bf16.msrb.mxu2 %v3195_v4  ;;  %v4354_v4 = vld [vmem:[#allocation7 + $0x184] sm:$0xf]  ;;  %v4417_v12 = vld [vmem:[#allocation10 + $0x174] sm:$0xf0]  ;;  %v3155_v14 = vor.u32 %v4338_v1, %v3152_v3  ;;  %v4383_v26 = vld [vmem:[#allocation10 + $0x64] sm:$0xf0] }
  0x83   :  { %798 = vmatpush.bf16.msrb.mxu3 %v3259_v11  ;;  %v3462_v11 = vld [vmem:[#allocation10 + $0x170] sm:$0xf]  ;;  %v4433_v16 = vld [vmem:[#allocation10 + $0x1f4] sm:$0xf0]  ;;  %v3219_v17 = vor.u32 %v4354_v4, %v3216_v5  ;;  %v3326_v25 = vld [vmem:[#allocation10 + $0x60] sm:$0xf] }
  0x84   :  { %760 = vmatpush.bf16.msrb.mxu0 %v3059_v21  ;;  %v3335_v21 = vor.u32 %v4385_v7, %v3334_v6  ;;  %v3390_v27 = vld [vmem:[#allocation10 + $0xe0] sm:$0xf]  ;;  %v4399_v29 = vld [vmem:[#allocation10 + $0xe4] sm:$0xf0]  ;;  %v3318_v37 = vld [vmem:[#allocation10 + $0x50] sm:$0xf] }
  0x85   :  { %773 = vmatpush.bf16.msrb.mxu1 %v3123_v23  ;;  %v3399_v23 = vor.u32 %v4401_v10, %v3398_v8  ;;  %v3454_v30 = vld [vmem:[#allocation10 + $0x160] sm:$0xf]  ;;  %v4415_v31 = vld [vmem:[#allocation10 + $0x164] sm:$0xf0]  ;;  %v4381_v38 = vld [vmem:[#allocation10 + $0x54] sm:$0xf0] }
  0x86   :  { %786 = vmatpush.bf16.msrb.mxu2 %v3187_v24  ;;  %v3463_v24 = vor.u32 %v4417_v12, %v3462_v11  ;;  %v3518_v32 = vld [vmem:[#allocation10 + $0x1e0] sm:$0xf]  ;;  %v4431_v33 = vld [vmem:[#allocation10 + $0x1e4] sm:$0xf0]  ;;  %v3382_v39 = vld [vmem:[#allocation10 + $0xd0] sm:$0xf] }
  0x87   :  { %799 = vmatpush.bf16.msrb.mxu3 %v3251_v28  ;;  %v3527_v28 = vor.u32 %v4433_v16, %v3526_v15  ;;  %v4397_v41 = vld [vmem:[#allocation10 + $0xd4] sm:$0xf0]  ;;  %v3446_v42 = vld [vmem:[#allocation10 + $0x150] sm:$0xf]  ;;  %v3310_v49 = vld [vmem:[#allocation10 + $0x40] sm:$0xf] }
  0x88   :  { %761 = vmatpush.bf16.msrb.mxu0 %v3051_v34  ;;  %v3327_v34 = vor.u32 %v4383_v26, %v3326_v25  ;;  %v4413_v43 = vld [vmem:[#allocation10 + $0x154] sm:$0xf0]  ;;  %v3510_v44 = vld [vmem:[#allocation10 + $0x1d0] sm:$0xf]  ;;  %v4379_v50 = vld [vmem:[#allocation10 + $0x44] sm:$0xf0] }
  0x89   :  { %774 = vmatpush.bf16.msrb.mxu1 %v3115_v35  ;;  %v3391_v35 = vor.u32 %v4399_v29, %v3390_v27  ;;  %v4429_v45 = vld [vmem:[#allocation10 + $0x1d4] sm:$0xf0]  ;;  %v3374_v51 = vld [vmem:[#allocation10 + $0xc0] sm:$0xf]  ;;  %v4411_v54 = vld [vmem:[#allocation10 + $0x144] sm:$0xf0] }
  0x8a   :  { %787 = vmatpush.bf16.msrb.mxu2 %v3179_v36  ;;  %v3455_v36 = vor.u32 %v4415_v31, %v3454_v30  ;;  %v3438_v53 = vld [vmem:[#allocation10 + $0x140] sm:$0xf]  ;;  %v3302_v57 = vld [vmem:[#allocation10 + $0x30] sm:$0xf]  ;;  %v4409_v63 = vld [vmem:[#allocation10 + $0x134] sm:$0xf0] }
  0x8b   :  { %800 = vmatpush.bf16.msrb.mxu3 %v3243_v40  ;;  %v3519_v40 = vor.u32 %v4431_v33, %v3518_v32  ;;  %v3502_v55 = vld [vmem:[#allocation10 + $0x1c0] sm:$0xf]  ;;  %v3366_v59 = vld [vmem:[#allocation10 + $0xb0] sm:$0xf]  ;;  %v4425_v1 = vld [vmem:[#allocation10 + $0x1b4] sm:$0xf0] }
  0x8c   :  { %762 = vmatpush.bf16.msrb.mxu0 %v3043_v46  ;;  %v3319_v46 = vor.u32 %v4381_v38, %v3318_v37  ;;  %v3494_v0 = vld [vmem:[#allocation10 + $0x1b0] sm:$0xf]  ;;  %v3294_v5 = vld [vmem:[#allocation10 + $0x20] sm:$0xf]  ;;  %v4375_v6 = vld [vmem:[#allocation10 + $0x24] sm:$0xf0] }
  0x8d   :  { %775 = vmatpush.bf16.msrb.mxu1 %v3107_v47  ;;  %v3383_v47 = vor.u32 %v4397_v41, %v3382_v39  ;;  %v3358_v7 = vld [vmem:[#allocation10 + $0xa0] sm:$0xf]  ;;  %v3495_v8 = vor.u32 %v4425_v1, %v3494_v0  ;;  %v4407_v11 = vld [vmem:[#allocation10 + $0x124] sm:$0xf0]  ;;  %v3286_v15 = vld [vmem:[#allocation10 + $0x10] sm:$0xf] }
  0x8e   :  { %788 = vmatpush.bf16.msrb.mxu2 %v3171_v48  ;;  %v3447_v48 = vor.u32 %v4413_v43, %v3446_v42  ;;  %v3422_v10 = vld [vmem:[#allocation10 + $0x120] sm:$0xf]  ;;  %v4373_v16 = vld [vmem:[#allocation10 + $0x14] sm:$0xf0]  ;;  %v3414_v25 = vld [vmem:[#allocation10 + $0x110] sm:$0xf] }
  0x8f   :  { %801 = vmatpush.bf16.msrb.mxu3 %v3235_v52  ;;  %v3511_v52 = vor.u32 %v4429_v45, %v3510_v44  ;;  %v3486_v12 = vld [vmem:[#allocation10 + $0x1a0] sm:$0xf]  ;;  %v4405_v27 = vld [vmem:[#allocation10 + $0x114] sm:$0xf0]  ;;  %v3287_v31 = vor.u32 %v4373_v16, %v3286_v15  ;;  %v4371_v32 = vld [vmem:[#allocation10 + $0x4] sm:$0xf0] }
  0x90   :  { %763 = vmatpush.bf16.msrb.mxu0 %v3035_v58  ;;  %v4377_v58 = vld [vmem:[#allocation10 + $0x34] sm:$0xf0]  ;;  %v3278_v30 = vld [vmem:[#allocation10] sm:$0xf]  ;;  %v4403_v38 = vld [vmem:[#allocation10 + $0x104] sm:$0xf0] }
  0x91   :  { %776 = vmatpush.bf16.msrb.mxu1 %v3099_v61  ;;  %v4393_v61 = vld [vmem:[#allocation10 + $0xb4] sm:$0xf0]  ;;  %v3342_v33 = vld [vmem:[#allocation10 + $0x80] sm:$0xf]  ;;  %v816_v39 = vld [vmem:[#allocation5 + $0x8] sm:$0xff]  ;;  %s5101_s16 = smov [#allocation28]  }
  0x92   :  { %789 = vmatpush.bf16.msrb.mxu2 %v3163_v62  ;;  %v3430_v62 = vld [vmem:[#allocation10 + $0x130] sm:$0xf]  ;;  %v3367_v3 = vor.u32 %v4393_v61, %v3366_v59  ;;  %v4421_v29 = vld [vmem:[#allocation10 + $0x194] sm:$0xf0]  ;;  %v3406_v37 = vld [vmem:[#allocation10 + $0x100] sm:$0xf] }
  0x93   :  { %802 = vmatpush.bf16.msrb.mxu3 %v3227_v2  ;;  %v3303_v2 = vor.u32 %v4377_v58, %v3302_v57  ;;  %v3431_v4 = vor.u32 %v4409_v63, %v3430_v62  ;;  %v3470_v41 = vld [vmem:[#allocation10 + $0x180] sm:$0xf]  ;;  %v4419_v42 = vld [vmem:[#allocation10 + $0x184] sm:$0xf0]  ;;  %v3590_v44 = vld [vmem:[#allocation10 + $0x270] sm:$0xf] }
  0x94   :  { %764 = vmatpush.bf16.msrb.mxu0 %v3027_v9  ;;  %v4391_v9 = vld [vmem:[#allocation10 + $0xa4] sm:$0xf0]  ;;  %v815_v43 = vld [vmem:[#allocation5] sm:$0xff]  ;;  %v4449_v45 = vld [vmem:[#allocation10 + $0x274] sm:$0xf0]  ;;  %s3000_s24 = sshll.u32 %s5101_s16, 4  ;;  %s3001_s24 = int_to_ptr.vmem [resolvable:$true] %s3000_s24 }
  0x95   :  { %777 = vmatpush.bf16.msrb.mxu1 %v3091_v13  ;;  %v4423_v13 = vld [vmem:[#allocation10 + $0x1a4] sm:$0xf0]  ;;  %v3582_v59 = vld [vmem:[#allocation10 + $0x260] sm:$0xf]  ;;  %v4461_v15 = vld [vmem:[#allocation10 + $0x2d4] sm:$0xf0] }
  0x96   :  { %790 = vmatpush.bf16.msrb.mxu2 %v3155_v14  ;;  %v3295_v14 = vor.u32 %v4375_v6, %v3294_v5  ;;  %v3487_v26 = vor.u32 %v4423_v13, %v3486_v12  ;;  %v3646_v61 = vld [vmem:[#allocation10 + $0x2e0] sm:$0xf]  ;;  %v4463_v63 = vld [vmem:[#allocation10 + $0x2e4] sm:$0xf0]  ;;  %v4445_v12 = vld [vmem:[#allocation10 + $0x254] sm:$0xf0] }
  0x97   :  { %803 = vmatpush.bf16.msrb.mxu3 %v3219_v17  ;;  %765 = vmatmul.bf16.vlgmr.msrb.gmra.mxu0 %v5277_v19  ;;  %v4427_v19 = vld [vmem:[#allocation10 + $0x1c4] sm:$0xf0]  ;;  %v3359_v17 = vor.u32 %v4391_v9, %v3358_v7  ;;  %v3710_v0 = vld [vmem:[#allocation10 + $0x360] sm:$0xf]  ;;  %v3647_v9 = vor.u32 %v4463_v63, %v3646_v61  ;;  %v3638_v13 = vld [vmem:[#allocation10 + $0x2d0] sm:$0xf] }
  0x98   :  { %1621 = vmatpush.bf16.msra.mxu0 %v3335_v21  ;;  %778 = vmatmul.bf16.vlgmr.msrb.gmra.mxu1 %v5281_v22  ;;  %v3439_v22 = vor.u32 %v4411_v54, %v3438_v53  ;;  %v3503_v60 = vor.u32 %v4427_v19, %v3502_v55  ;;  %v3423_v21 = vor.u32 %v4407_v11, %v3422_v10  ;;  %v3782_v53 = vld [vmem:[#allocation10 + $0x3f0] sm:$0xf]  ;;  %v4497_v54 = vld [vmem:[#allocation10 + $0x3f4] sm:$0xf0]  ;;  %v957_v55 = vunpack.c.l.b16 %v815_v43  ;;  %v4479_v1 = vld [vmem:[#allocation10 + $0x364] sm:$0xf0] }
  0x99   :  { %1634 = vmatpush.bf16.msra.mxu1 %v3399_v23  ;;  %791 = vmatmul.bf16.vlgmr.msrb.gmra.mxu2 %v5275_v18  ;;  %v4395_v18 = vld [vmem:[#allocation10 + $0xc4] sm:$0xf0]  ;;  %v3350_v23 = vld [vmem:[#allocation10 + $0x90] sm:$0xf]  ;;  %v960_v19 = vunpack.c.h.b16 %v816_v39  ;;  %v3783_v62 = vor.u32 %v4497_v54, %v3782_v53  ;;  %v3711_v10 = vor.u32 %v4479_v1, %v3710_v0  ;;  %v4453_v63 = vld [vmem:[#allocation10 + $0x294] sm:$0xf0] }
  0x9a   :  { %1647 = vmatpush.bf16.msra.mxu2 %v3463_v24  ;;  %804 = vmatmul.bf16.vlgmr.msrb.gmra.mxu3 %v5279_v20  ;;  %v3311_v20 = vor.u32 %v4379_v50, %v3310_v49  ;;  %v3375_v56 = vor.u32 %v4395_v18, %v3374_v51  ;;  %v4389_v24 = vld [vmem:[#allocation10 + $0x94] sm:$0xf0]  ;;  %v3718_v49 = vld [vmem:[#allocation10 + $0x370] sm:$0xf]  ;;  %v959_v51 = vunpack.c.l.b16 %v816_v39  ;;  %v3407_v18 = vor.u32 %v4403_v38, %v3406_v37  ;;  %v4455_v54 = vld [vmem:[#allocation10 + $0x2a4] sm:$0xf0] }
  0x9b   :  { %1660 = vmatpush.bf16.msra.mxu3 %v3527_v28  ;;  %v3478_v28 = vld [vmem:[#allocation10 + $0x190] sm:$0xf]  ;;  %v4481_v50 = vld [vmem:[#allocation10 + $0x374] sm:$0xf0]  ;;  %v5293_v5 = vpack.c.b16 %v957_v55, %v957_v55  ;;  %v5295_v6 = vpack.c.b16 %v960_v19, %v960_v19  ;;  %v3678_v55 = vld [vmem:[#allocation10 + $0x320] sm:$0xf] }
  0x9c   :  { %1622 = vmatpush.bf16.msra.mxu0 %v3327_v34  ;;  %v4387_v34 = vld [vmem:[#allocation10 + $0x84] sm:$0xf0]  ;;  %v3719_v58 = vor.u32 %v4481_v50, %v3718_v49  ;;  %v3574_v11 = vld [vmem:[#allocation10 + $0x250] sm:$0xf]  ;;  %v4469_v1 = vld [vmem:[#allocation10 + $0x314] sm:$0xf0] }
  0x9d   :  { %1635 = vmatpush.bf16.msra.mxu1 %v3391_v35  ;;  %v3351_v35 = vor.u32 %v4389_v24, %v3350_v23  ;;  %v3702_v16 = vld [vmem:[#allocation10 + $0x350] sm:$0xf]  ;;  %v4493_v23 = vld [vmem:[#allocation10 + $0x3d4] sm:$0xf0]  ;;  %v3575_v24 = vor.u32 %v4445_v12, %v3574_v11  ;;  %v4471_v19 = vld [vmem:[#allocation10 + $0x324] sm:$0xf0] }
  0x9e   :  { %1648 = vmatpush.bf16.msra.mxu2 %v3455_v36  ;;  %v3415_v36 = vor.u32 %v4405_v27, %v3414_v25  ;;  %v3639_v25 = vor.u32 %v4461_v15, %v3638_v13  ;;  %v3566_v27 = vld [vmem:[#allocation10 + $0x240] sm:$0xf]  ;;  %v3558_v39 = vld [vmem:[#allocation10 + $0x230] sm:$0xf]  ;;  %v4451_v12 = vld [vmem:[#allocation10 + $0x284] sm:$0xf0] }
  0x9f   :  { %1661 = vmatpush.bf16.msra.mxu3 %v3519_v40  ;;  %v3479_v40 = vor.u32 %v4421_v29, %v3478_v28  ;;  %v4443_v28 = vld [vmem:[#allocation10 + $0x244] sm:$0xf0]  ;;  %v3630_v29 = vld [vmem:[#allocation10 + $0x2c0] sm:$0xf]  ;;  %v3606_v61 = vld [vmem:[#allocation10 + $0x290] sm:$0xf] }
  0xa0   :  { %1623 = vmatpush.bf16.msra.mxu0 %v3319_v46  ;;  %v3654_v46 = vld [vmem:[#allocation10 + $0x2f0] sm:$0xf]  ;;  %v3598_v11 = vld [vmem:[#allocation10 + $0x280] sm:$0xf]  ;;  %v3607_v13 = vor.u32 %v4453_v63, %v3606_v61  ;;  %v3384_v61 = vld [vmem:[#allocation10 + $0xd8] sm:$0xf0] }
  0xa1   :  { %1636 = vmatpush.bf16.msra.mxu1 %v3383_v47  ;;  %v3279_v47 = vor.u32 %v4371_v32, %v3278_v30  ;;  %v3694_v32 = vld [vmem:[#allocation10 + $0x340] sm:$0xf]  ;;  %v3670_v0 = vld [vmem:[#allocation10 + $0x310] sm:$0xf]  ;;  %v3448_v63 = vld [vmem:[#allocation10 + $0x158] sm:$0xf0] }
  0xa2   :  { %1649 = vmatpush.bf16.msra.mxu2 %v3447_v48  ;;  %v4465_v48 = vld [vmem:[#allocation10 + $0x2f4] sm:$0xf0]  ;;  %v3662_v15 = vld [vmem:[#allocation10 + $0x300] sm:$0xf]  ;;  %s5497_s25 = sld [smem:[#allocation46_spill]] }
  0xa3   :  { %1662 = vmatpush.bf16.msra.mxu3 %v3511_v52  ;;  %v3343_v52 = vor.u32 %v4387_v34, %v3342_v33  ;;  %v3655_v57 = vor.u32 %v4465_v48, %v3654_v46  ;;  %v4475_v33 = vld [vmem:[#allocation10 + $0x344] sm:$0xf0]  ;;  %v3758_v34 = vld [vmem:[#allocation10 + $0x3c0] sm:$0xf]  ;;  %v3750_v46 = vld [vmem:[#allocation10 + $0x3b0] sm:$0xf] }
  0xa4   :  { %1624 = vmatpush.bf16.msra.mxu0 %v3311_v20  ;;  %v3471_v20 = vor.u32 %v4419_v42, %v3470_v41  ;;  %v3695_v38 = vor.u32 %v4475_v33, %v3694_v32  ;;  %v3622_v41 = vld [vmem:[#allocation10 + $0x2b0] sm:$0xf]  ;;  %v3464_v32 = vld [vmem:[#allocation10 + $0x178] sm:$0xf0] }
  0xa5   :  { %1637 = vmatpush.bf16.msra.mxu1 %v3375_v56  ;;  %v3591_v56 = vor.u32 %v4449_v45, %v3590_v44  ;;  %v3686_v44 = vld [vmem:[#allocation10 + $0x330] sm:$0xf]  ;;  %v4473_v45 = vld [vmem:[#allocation10 + $0x334] sm:$0xf0] }
  0xa6   :  { %1650 = vmatpush.bf16.msra.mxu2 %v3439_v22  ;;  %v958_v22 = vunpack.c.h.b16 %v815_v43  ;;  %v4457_v43 = vld [vmem:[#allocation10 + $0x2b4] sm:$0xf0]  ;;  %v3687_v50 = vor.u32 %v4473_v45, %v3686_v44  ;;  %v4382_v45 = vld [vmem:[#allocation10 + $0x64] sm:$0xf] }
  0xa7   :  { %1663 = vmatpush.bf16.msra.mxu3 %v3503_v60  ;;  %v4447_v60 = vld [vmem:[#allocation10 + $0x264] sm:$0xf0]  ;;  %v3623_v49 = vor.u32 %v4457_v43, %v3622_v41 }
  0xa8   :  { %1625 = vmatpush.bf16.msra.mxu0 %v3303_v2  ;;  %v5291_v2 = vpack.c.b16 %v959_v51, %v959_v51  ;;  %v3583_v7 = vor.u32 %v4447_v60, %v3582_v59  ;;  %v3550_v51 = vld [vmem:[#allocation10 + $0x220] sm:$0xf]  ;;  %v3542_v59 = vld [vmem:[#allocation10 + $0x210] sm:$0xf]  ;;  %v4437_v60 = vld [vmem:[#allocation10 + $0x214] sm:$0xf0] }
  0xa9   :  { %1638 = vmatpush.bf16.msra.mxu1 %v3367_v3  ;;  %v3774_v3 = vld [vmem:[#allocation10 + $0x3e0] sm:$0xf]  ;;  %s3002_s26 = sshll.u32 %s5497_s25, 4  ;;  %s3003_s26 = int_to_ptr.hbm [resolvable:$true] %s3002_s26 }
  0xaa   :  { %1651 = vmatpush.bf16.msra.mxu2 %v3431_v4  ;;  %v4495_v4 = vld [vmem:[#allocation10 + $0x3e4] sm:$0xf0] }
  0xab   :  { %1664 = vmatpush.bf16.msra.mxu3 %v3495_v8  ;;  %v5297_v8 = vpack.c.b16 %v958_v22, %v958_v22 }
  0xac   :  { %1626 = vmatpush.bf16.msra.mxu0 %v3295_v14  ;;  %v3775_v14 = vor.u32 %v4495_v4, %v3774_v3  ;;  %v3734_v3 = vld [vmem:[#allocation10 + $0x390] sm:$0xf]  ;;  %v4485_v4 = vld [vmem:[#allocation10 + $0x394] sm:$0xf0] }
  0xad   :  { %1639 = vmatpush.bf16.msra.mxu1 %v3359_v17  ;;  %v4477_v17 = vld [vmem:[#allocation10 + $0x354] sm:$0xf0] }
  0xae   :  { %1652 = vmatpush.bf16.msra.mxu2 %v3423_v21  ;;  %v3766_v21 = vld [vmem:[#allocation10 + $0x3d0] sm:$0xf] }
  0xaf   :  { %1665 = vmatpush.bf16.msra.mxu3 %v3487_v26  ;;  %v3703_v26 = vor.u32 %v4477_v17, %v3702_v16  ;;  %v3767_v30 = vor.u32 %v4493_v23, %v3766_v21  ;;  %v4467_v16 = vld [vmem:[#allocation10 + $0x304] sm:$0xf0]  ;;  %v818_v17 = vld [vmem:[#allocation5 + $0x18] sm:$0xff]  ;;  %v3735_v21 = vor.u32 %v4485_v4, %v3734_v3  ;;  %v3726_v23 = vld [vmem:[#allocation10 + $0x380] sm:$0xf] }
  0xb0   :  { %1627 = vmatpush.bf16.msra.mxu0 %v3287_v31  ;;  %v4459_v31 = vld [vmem:[#allocation10 + $0x2c4] sm:$0xf0]  ;;  %v963_v33 = vunpack.c.l.b16 %v818_v17 }
  0xb1   :  { %1640 = vmatpush.bf16.msra.mxu1 %v3351_v35  ;;  %v4491_v35 = vld [vmem:[#allocation10 + $0x3c4] sm:$0xf0]  ;;  %v3631_v37 = vor.u32 %v4459_v31, %v3630_v29  ;;  %v4416_v31 = vld [vmem:[#allocation10 + $0x174] sm:$0xf] }
  0xb2   :  { %1653 = vmatpush.bf16.msra.mxu2 %v3415_v36  ;;  %v3567_v36 = vor.u32 %v4443_v28, %v3566_v27  ;;  %v3759_v42 = vor.u32 %v4491_v35, %v3758_v34  ;;  %v3336_v27 = vld [vmem:[#allocation10 + $0x78] sm:$0xf0]  ;;  %v4400_v28 = vld [vmem:[#allocation10 + $0xf4] sm:$0xf]  ;;  %v3599_v34 = vor.u32 %v4451_v12, %v3598_v11  ;;  %v3663_v35 = vor.u32 %v4467_v16, %v3662_v15  ;;  %v4394_v11 = vld [vmem:[#allocation10 + $0xc4] sm:$0xf] }
  0xb3   :  { %1666 = vmatpush.bf16.msra.mxu3 %v3479_v40  ;;  %v4441_v40 = vld [vmem:[#allocation10 + $0x234] sm:$0xf0]  ;;  %v3467_v44 = vor.u32 %v4416_v31, %v3464_v32  ;;  %v3440_v15 = vld [vmem:[#allocation10 + $0x148] sm:$0xf0]  ;;  %v4426_v16 = vld [vmem:[#allocation10 + $0x1c4] sm:$0xf] }
  0xb4   :  { %1628 = vmatpush.bf16.msra.mxu0 %v3279_v47  ;;  %v4489_v47 = vld [vmem:[#allocation10 + $0x3b4] sm:$0xf0]  ;;  %v3559_v48 = vor.u32 %v4441_v40, %v3558_v39  ;;  %v964_v39 = vunpack.c.h.b16 %v818_v17  ;;  %v3504_v17 = vld [vmem:[#allocation10 + $0x1c8] sm:$0xf0]  ;;  %v3432_v31 = vld [vmem:[#allocation10 + $0x138] sm:$0xf0] }
  0xb5   :  { %1641 = vmatpush.bf16.msra.mxu1 %v3343_v52  ;;  %v4439_v52 = vld [vmem:[#allocation10 + $0x224] sm:$0xf0]  ;;  %v3751_v53 = vor.u32 %v4489_v47, %v3750_v46  ;;  %v3328_v46 = vld [vmem:[#allocation10 + $0x68] sm:$0xf0]  ;;  %v4398_v47 = vld [vmem:[#allocation10 + $0xe4] sm:$0xf] }
  0xb6   :  { %1654 = vmatpush.bf16.msra.mxu2 %v3407_v18  ;;  %v3614_v18 = vld [vmem:[#allocation10 + $0x2a0] sm:$0xf]  ;;  %v3551_v22 = vor.u32 %v4439_v52, %v3550_v51  ;;  %v4414_v51 = vld [vmem:[#allocation10 + $0x164] sm:$0xf]  ;;  %v3456_v52 = vld [vmem:[#allocation10 + $0x168] sm:$0xf0] }
  0xb7   :  { %1667 = vmatpush.bf16.msra.mxu3 %v3471_v20  ;;  %1629 = vmatmul.bf16.vlgmr.msra.gmra.mxu0 %v5293_v5  ;;  %v3742_v20 = vld [vmem:[#allocation10 + $0x3a0] sm:$0xf]  ;;  %v4424_v32 = vld [vmem:[#allocation10 + $0x1b4] sm:$0xf] }
  0xb8   :  { %1673 = vmatpush.bf16.msrb.mxu0 %v3591_v56  ;;  %1642 = vmatmul.bf16.vlgmr.msra.gmra.mxu1 %v5297_v8  ;;  %v4487_v56 = vld [vmem:[#allocation10 + $0x3a4] sm:$0xf0] }
  0xb9   :  { %1686 = vmatpush.bf16.msrb.mxu1 %v3655_v57  ;;  %1655 = vmatmul.bf16.vlgmr.msra.gmra.mxu2 %v5291_v2  ;;  %v3615_v57 = vor.u32 %v4455_v54, %v3614_v18  ;;  %v4430_v54 = vld [vmem:[#allocation10 + $0x1e4] sm:$0xf] }
  0xba   :  { %1699 = vmatpush.bf16.msrb.mxu2 %v3719_v58  ;;  %1668 = vmatmul.bf16.vlgmr.msra.gmra.mxu3 %v5295_v6  ;;  %v3679_v58 = vor.u32 %v4471_v19, %v3678_v55  ;;  %v3520_v55 = vld [vmem:[#allocation10 + $0x1e8] sm:$0xf0]  ;;  %v3331_v19 = vor.u32 %v4382_v45, %v3328_v46 }
  0xbb   :  { %1712 = vmatpush.bf16.msrb.mxu3 %v3783_v62  ;;  %v3743_v62 = vor.u32 %v4487_v56, %v3742_v20  ;;  %v3488_v45 = vld [vmem:[#allocation10 + $0x1a8] sm:$0xf0] }
  0xbc   :  { %1674 = vmatpush.bf16.msrb.mxu0 %v3583_v7  ;;  %v3534_v7 = vld [vmem:[#allocation10 + $0x200] sm:$0xf] }
  0xbd   :  { %1687 = vmatpush.bf16.msrb.mxu1 %v3647_v9  ;;  %v3543_v9 = vor.u32 %v4437_v60, %v3542_v59  ;;  %v4396_v59 = vld [vmem:[#allocation10 + $0xd4] sm:$0xf]  ;;  %v3523_v60 = vor.u32 %v4430_v54, %v3520_v55  ;;  %v3352_v55 = vld [vmem:[#allocation10 + $0x98] sm:$0xf0] }
  0xbe   :  { %1700 = vmatpush.bf16.msrb.mxu2 %v3711_v10  ;;  %v4435_v10 = vld [vmem:[#allocation10 + $0x204] sm:$0xf0]  ;;  %v3387_v4 = vor.u32 %v4396_v59, %v3384_v61  ;;  %v4370_v59 = vld [vmem:[#allocation10 + $0x4] sm:$0xf] }
  0xbf   :  { %1713 = vmatpush.bf16.msrb.mxu3 %v3775_v14  ;;  %v3671_v14 = vor.u32 %v4469_v1, %v3670_v0  ;;  %v3535_v29 = vor.u32 %v4435_v10, %v3534_v7  ;;  %v4428_v0 = vld [vmem:[#allocation10 + $0x1d4] sm:$0xf]  ;;  %v3512_v1 = vld [vmem:[#allocation10 + $0x1d8] sm:$0xf0]  ;;  %v3312_v10 = vld [vmem:[#allocation10 + $0x48] sm:$0xf0] }
  0xc0   :  { %1675 = vmatpush.bf16.msrb.mxu0 %v3575_v24  ;;  %v4483_v24 = vld [vmem:[#allocation10 + $0x384] sm:$0xf0]  ;;  %v3515_v12 = vor.u32 %v4428_v0, %v3512_v1  ;;  %v3344_v0 = vld [vmem:[#allocation10 + $0x88] sm:$0xf0]  ;;  %v4402_v1 = vld [vmem:[#allocation10 + $0x104] sm:$0xf] }
  0xc1   :  { %1688 = vmatpush.bf16.msrb.mxu1 %v3639_v25  ;;  %v817_v25 = vld [vmem:[#allocation5 + $0x10] sm:$0xff]  ;;  %v3727_v40 = vor.u32 %v4483_v24, %v3726_v23 }
  0xc2   :  { %1701 = vmatpush.bf16.msrb.mxu2 %v3703_v26  ;;  %v4384_v26 = vld [vmem:[#allocation10 + $0x74] sm:$0xf] }
  0xc3   :  { %1714 = vmatpush.bf16.msrb.mxu3 %v3767_v30  ;;  %v3400_v30 = vld [vmem:[#allocation10 + $0xf8] sm:$0xf0]  ;;  %v3339_v41 = vor.u32 %v4384_v26, %v3336_v27  ;;  %v4392_v27 = vld [vmem:[#allocation10 + $0xb4] sm:$0xf] }
  0xc4   :  { %1676 = vmatpush.bf16.msrb.mxu0 %v3567_v36  ;;  %v4432_v36 = vld [vmem:[#allocation10 + $0x1f4] sm:$0xf]  ;;  %v3403_v43 = vor.u32 %v4400_v28, %v3400_v30  ;;  %v3304_v26 = vld [vmem:[#allocation10 + $0x38] sm:$0xf0]  ;;  %v3507_v28 = vor.u32 %v4426_v16, %v3504_v17 }
  0xc5   :  { %1689 = vmatpush.bf16.msrb.mxu1 %v3631_v37  ;;  %v3528_v37 = vld [vmem:[#allocation10 + $0x1f8] sm:$0xf0]  ;;  %v4408_v30 = vld [vmem:[#allocation10 + $0x134] sm:$0xf] }
  0xc6   :  { %1702 = vmatpush.bf16.msrb.mxu2 %v3695_v38  ;;  %v961_v38 = vunpack.c.l.b16 %v817_v25  ;;  %v3720_v16 = vld [vmem:[#allocation10 + $0x378] sm:$0xf0] }
  0xc7   :  { %1715 = vmatpush.bf16.msrb.mxu3 %v3759_v42  ;;  %v962_v42 = vunpack.c.h.b16 %v817_v25  ;;  %v4376_v25 = vld [vmem:[#allocation10 + $0x34] sm:$0xf] }
  0xc8   :  { %1677 = vmatpush.bf16.msrb.mxu0 %v3559_v48  ;;  %v3531_v48 = vor.u32 %v4432_v36, %v3528_v37  ;;  %v5305_v18 = vpack.c.b16 %v961_v38, %v961_v38  ;;  %v3435_v36 = vor.u32 %v4408_v30, %v3432_v31  ;;  %v4374_v37 = vld [vmem:[#allocation10 + $0x24] sm:$0xf]  ;;  %v3296_v38 = vld [vmem:[#allocation10 + $0x28] sm:$0xf0] }
  0xc9   :  { %1690 = vmatpush.bf16.msrb.mxu1 %v3623_v49  ;;  %v5303_v49 = vpack.c.b16 %v963_v33, %v963_v33  ;;  %v5309_v20 = vpack.c.b16 %v962_v42, %v962_v42  ;;  %v3496_v33 = vld [vmem:[#allocation10 + $0x1b8] sm:$0xf0]  ;;  %v4406_v42 = vld [vmem:[#allocation10 + $0x124] sm:$0xf]  ;;  %v3299_v46 = vor.u32 %v4374_v37, %v3296_v38  ;;  %v3584_v30 = vld [vmem:[#allocation10 + $0x268] sm:$0xf0] }
  0xca   :  { %1703 = vmatpush.bf16.msrb.mxu2 %v3687_v50  ;;  %v3392_v50 = vld [vmem:[#allocation10 + $0xe8] sm:$0xf0]  ;;  %v4462_v31 = vld [vmem:[#allocation10 + $0x2e4] sm:$0xf] }
  0xcb   :  { %1716 = vmatpush.bf16.msrb.mxu3 %v3751_v53  ;;  %v5307_v53 = vpack.c.b16 %v964_v39, %v964_v39  ;;  %v3395_v56 = vor.u32 %v4398_v47, %v3392_v50  ;;  %v4390_v39 = vld [vmem:[#allocation10 + $0xa4] sm:$0xf]  ;;  %v4372_v50 = vld [vmem:[#allocation10 + $0x14] sm:$0xf]  ;;  %v3776_v37 = vld [vmem:[#allocation10 + $0x3e8] sm:$0xf0] }
  0xcc   :  { %1678 = vmatpush.bf16.msrb.mxu0 %v3551_v22  ;;  %v3459_v22 = vor.u32 %v4414_v51, %v3456_v52  ;;  %v3288_v51 = vld [vmem:[#allocation10 + $0x18] sm:$0xf0]  ;;  %v4388_v52 = vld [vmem:[#allocation10 + $0x94] sm:$0xf] }
  0xcd   :  { %1691 = vmatpush.bf16.msrb.mxu1 %v3615_v57  ;;  %v4380_v57 = vld [vmem:[#allocation10 + $0x54] sm:$0xf]  ;;  %v3355_v61 = vor.u32 %v4388_v52, %v3352_v55  ;;  %v4442_v55 = vld [vmem:[#allocation10 + $0x244] sm:$0xf] }
  0xce   :  { %1704 = vmatpush.bf16.msrb.mxu2 %v3679_v58  ;;  %v3320_v58 = vld [vmem:[#allocation10 + $0x58] sm:$0xf0] }
  0xcf   :  { %1717 = vmatpush.bf16.msrb.mxu3 %v3743_v62  ;;  %v4412_v62 = vld [vmem:[#allocation10 + $0x154] sm:$0xf]  ;;  %v3323_v3 = vor.u32 %v4380_v57, %v3320_v58  ;;  %v3480_v57 = vld [vmem:[#allocation10 + $0x198] sm:$0xf0]  ;;  %v3291_v58 = vor.u32 %v4372_v50, %v3288_v51 }
  0xd0   :  { %1679 = vmatpush.bf16.msrb.mxu0 %v3543_v9  ;;  %v3451_v7 = vor.u32 %v4412_v62, %v3448_v63  ;;  %v4378_v9 = vld [vmem:[#allocation10 + $0x44] sm:$0xf]  ;;  %v3768_v50 = vld [vmem:[#allocation10 + $0x3d8] sm:$0xf0] }
  0xd1   :  { %1692 = vmatpush.bf16.msrb.mxu1 %v3607_v13  ;;  %v3376_v13 = vld [vmem:[#allocation10 + $0xc8] sm:$0xf0]  ;;  %v4386_v63 = vld [vmem:[#allocation10 + $0x84] sm:$0xf] }
  0xd2   :  { %1705 = vmatpush.bf16.msrb.mxu2 %v3671_v14  ;;  %v4410_v14 = vld [vmem:[#allocation10 + $0x144] sm:$0xf]  ;;  %v3379_v23 = vor.u32 %v4394_v11, %v3376_v13  ;;  %v3592_v11 = vld [vmem:[#allocation10 + $0x278] sm:$0xf0]  ;;  %v3347_v17 = vor.u32 %v4386_v63, %v3344_v0  ;;  %v4456_v63 = vld [vmem:[#allocation10 + $0x2b4] sm:$0xf] }
  0xd3   :  { %1718 = vmatpush.bf16.msrb.mxu3 %v3735_v21  ;;  %v3315_v21 = vor.u32 %v4378_v9, %v3312_v10  ;;  %v3443_v24 = vor.u32 %v4410_v14, %v3440_v15  ;;  %v3472_v9 = vld [vmem:[#allocation10 + $0x188] sm:$0xf0]  ;;  %v4448_v10 = vld [vmem:[#allocation10 + $0x274] sm:$0xf]  ;;  %v3656_v14 = vld [vmem:[#allocation10 + $0x2f8] sm:$0xf0] }
  0xd4   :  { %1680 = vmatpush.bf16.msrb.mxu0 %v3535_v29  ;;  %v3368_v29 = vld [vmem:[#allocation10 + $0xb8] sm:$0xf0]  ;;  %v4480_v15 = vld [vmem:[#allocation10 + $0x374] sm:$0xf] }
  0xd5   :  { %1693 = vmatpush.bf16.msrb.mxu1 %v3599_v34  ;;  %v3307_v34 = vor.u32 %v4376_v25, %v3304_v26  ;;  %v3595_v26 = vor.u32 %v4448_v10, %v3592_v11  ;;  %v3624_v0 = vld [vmem:[#allocation10 + $0x2b8] sm:$0xf0] }
  0xd6   :  { %1706 = vmatpush.bf16.msrb.mxu2 %v3663_v35  ;;  %v3371_v35 = vor.u32 %v4392_v27, %v3368_v29  ;;  %v4446_v29 = vld [vmem:[#allocation10 + $0x264] sm:$0xf]  ;;  %v3752_v10 = vld [vmem:[#allocation10 + $0x3b8] sm:$0xf0] }
  0xd7   :  { %1719 = vmatpush.bf16.msrb.mxu3 %v3727_v40  ;;  %1681 = vmatmul.bf16.vlgmr.msrb.gmra.mxu0 %v5305_v18  ;;  %v3499_v40 = vor.u32 %v4424_v32, %v3496_v33  ;;  %v3648_v33 = vld [vmem:[#allocation10 + $0x2e8] sm:$0xf0]  ;;  %v3587_v38 = vor.u32 %v4446_v29, %v3584_v30 }
  0xd8   :  { %1725 = vmatpush.bf16.msra.mxu0 %v3339_v41  ;;  %1694 = vmatmul.bf16.vlgmr.msrb.gmra.mxu1 %v5309_v20  ;;  %v3360_v41 = vld [vmem:[#allocation10 + $0xa8] sm:$0xf0] }
  0xd9   :  { %1738 = vmatpush.bf16.msra.mxu1 %v3403_v43  ;;  %1707 = vmatmul.bf16.vlgmr.msrb.gmra.mxu2 %v5303_v49  ;;  %v3424_v43 = vld [vmem:[#allocation10 + $0x128] sm:$0xf0]  ;;  %v3363_v47 = vor.u32 %v4390_v39, %v3360_v41  ;;  %v3651_v39 = vor.u32 %v4462_v31, %v3648_v33  ;;  %v4444_v41 = vld [vmem:[#allocation10 + $0x254] sm:$0xf]  ;;  %v3544_v33 = vld [vmem:[#allocation10 + $0x218] sm:$0xf0] }
  0xda   :  { %1751 = vmatpush.bf16.msra.mxu2 %v3467_v44  ;;  %1720 = vmatmul.bf16.vlgmr.msrb.gmra.mxu3 %v5307_v53  ;;  %v4422_v44 = vld [vmem:[#allocation10 + $0x1a4] sm:$0xf] }
  0xdb   :  { %1764 = vmatpush.bf16.msra.mxu3 %v3531_v48  ;;  %v3427_v48 = vor.u32 %v4406_v42, %v3424_v43  ;;  %v3491_v54 = vor.u32 %v4422_v44, %v3488_v45  ;;  %v3576_v42 = vld [vmem:[#allocation10 + $0x258] sm:$0xf0]  ;;  %v4460_v43 = vld [vmem:[#allocation10 + $0x2d4] sm:$0xf] }
  0xdc   :  { %1726 = vmatpush.bf16.msra.mxu0 %v3331_v19  ;;  %v4404_v19 = vld [vmem:[#allocation10 + $0x114] sm:$0xf]  ;;  %v3640_v45 = vld [vmem:[#allocation10 + $0x2d8] sm:$0xf0]  ;;  %v3579_v51 = vor.u32 %v4444_v41, %v3576_v42 }
  0xdd   :  { %1739 = vmatpush.bf16.msra.mxu1 %v3395_v56  ;;  %v3416_v56 = vld [vmem:[#allocation10 + $0x118] sm:$0xf0]  ;;  %v3643_v52 = vor.u32 %v4460_v43, %v3640_v45  ;;  %v4484_v41 = vld [vmem:[#allocation10 + $0x394] sm:$0xf]  ;;  %v4434_v45 = vld [vmem:[#allocation10 + $0x204] sm:$0xf] }
  0xde   :  { %1752 = vmatpush.bf16.msra.mxu2 %v3459_v22  ;;  %v4420_v22 = vld [vmem:[#allocation10 + $0x194] sm:$0xf]  ;;  %v3419_v62 = vor.u32 %v4404_v19, %v3416_v56  ;;  %v3568_v19 = vld [vmem:[#allocation10 + $0x248] sm:$0xf0]  ;;  %v3736_v42 = vld [vmem:[#allocation10 + $0x398] sm:$0xf0] }
  0xdf   :  { %1765 = vmatpush.bf16.msra.mxu3 %v3523_v60  ;;  %v3280_v60 = vld [vmem:[#allocation10 + $0x8] sm:$0xf0] }
  0xe0   :  { %1727 = vmatpush.bf16.msra.mxu0 %v3323_v3  ;;  %v3483_v3 = vor.u32 %v4420_v22, %v3480_v57  ;;  %v3283_v13 = vor.u32 %v4370_v59, %v3280_v60  ;;  %v3632_v22 = vld [vmem:[#allocation10 + $0x2c8] sm:$0xf0]  ;;  %v4474_v57 = vld [vmem:[#allocation10 + $0x344] sm:$0xf]  ;;  %v4440_v60 = vld [vmem:[#allocation10 + $0x234] sm:$0xf] }
  0xe1   :  { %1740 = vmatpush.bf16.msra.mxu1 %v3387_v4  ;;  %v3408_v4 = vld [vmem:[#allocation10 + $0x108] sm:$0xf0]  ;;  %v4490_v59 = vld [vmem:[#allocation10 + $0x3c4] sm:$0xf] }
  0xe2   :  { %1753 = vmatpush.bf16.msra.mxu2 %v3451_v7  ;;  %v4418_v7 = vld [vmem:[#allocation10 + $0x184] sm:$0xf] }
  0xe3   :  { %1766 = vmatpush.bf16.msra.mxu3 %v3515_v12  ;;  %v4464_v12 = vld [vmem:[#allocation10 + $0x2f4] sm:$0xf]  ;;  %v3475_v25 = vor.u32 %v4418_v7, %v3472_v9  ;;  %v5319_v7 = vld [vmem:[#allocation8] sm:$0x3] }
  0xe4   :  { %1728 = vmatpush.bf16.msra.mxu0 %v3315_v21  ;;  %v3411_v21 = vor.u32 %v4402_v1, %v3408_v4  ;;  %v3659_v27 = vor.u32 %v4464_v12, %v3656_v14  ;;  %v3688_v4 = vld [vmem:[#allocation10 + $0x338] sm:$0xf0]  ;;  %v4488_v9 = vld [vmem:[#allocation10 + $0x3b4] sm:$0xf]  ;;  %v4438_v12 = vld [vmem:[#allocation10 + $0x224] sm:$0xf] }
  0xe5   :  { %1741 = vmatpush.bf16.msra.mxu1 %v3379_v23  ;;  %v4496_v23 = vld [vmem:[#allocation10 + $0x3f4] sm:$0xf] }
  0xe6   :  { %1754 = vmatpush.bf16.msra.mxu2 %v3443_v24  ;;  %v3784_v24 = vld [vmem:[#allocation10 + $0x3f8] sm:$0xf0] }
  0xe7   :  { %1767 = vmatpush.bf16.msra.mxu3 %v3507_v28  ;;  %v3723_v28 = vor.u32 %v4480_v15, %v3720_v16  ;;  %v3787_v32 = vor.u32 %v4496_v23, %v3784_v24  ;;  %v3552_v15 = vld [vmem:[#allocation10 + $0x228] sm:$0xf0]  ;;  %v4454_v16 = vld [vmem:[#allocation10 + $0x2a4] sm:$0xf] }
  0xe8   :  { %1729 = vmatpush.bf16.msra.mxu0 %v3307_v34  ;;  %v4478_v34 = vld [vmem:[#allocation10 + $0x364] sm:$0xf]  ;;  %v3616_v23 = vld [vmem:[#allocation10 + $0x2a8] sm:$0xf0] }
  0xe9   :  { %1742 = vmatpush.bf16.msra.mxu1 %v3371_v35  ;;  %v3712_v35 = vld [vmem:[#allocation10 + $0x368] sm:$0xf0]  ;;  %v4470_v24 = vld [vmem:[#allocation10 + $0x324] sm:$0xf]  ;;  %v3619_v30 = vor.u32 %v4454_v16, %v3616_v23  ;;  %v4540_v23 = vld [vmem:[#allocation14 + $0x54] sm:$0xf] }
  0xea   :  { %1755 = vmatpush.bf16.msra.mxu2 %v3435_v36  ;;  %v4494_v36 = vld [vmem:[#allocation10 + $0x3e4] sm:$0xf] }
  0xeb   :  { %1768 = vmatpush.bf16.msra.mxu3 %v3499_v40  ;;  %v3715_v40 = vor.u32 %v4478_v34, %v3712_v35  ;;  %v3779_v44 = vor.u32 %v4494_v36, %v3776_v37  ;;  %v4452_v34 = vld [vmem:[#allocation10 + $0x294] sm:$0xf] }
  0xec   :  { %1730 = vmatpush.bf16.msra.mxu0 %v3299_v46  ;;  %v4476_v46 = vld [vmem:[#allocation10 + $0x354] sm:$0xf] }
  0xed   :  { %1743 = vmatpush.bf16.msra.mxu1 %v3363_v47  ;;  %v3704_v47 = vld [vmem:[#allocation10 + $0x358] sm:$0xf0] }
  0xee   :  { %1756 = vmatpush.bf16.msra.mxu2 %v3427_v48  ;;  %v4492_v48 = vld [vmem:[#allocation10 + $0x3d4] sm:$0xf] }
  0xef   :  { %1769 = vmatpush.bf16.msra.mxu3 %v3491_v54  ;;  %v3707_v54 = vor.u32 %v4476_v46, %v3704_v47  ;;  %v3771_v56 = vor.u32 %v4492_v48, %v3768_v50  ;;  %v3536_v48 = vld [vmem:[#allocation10 + $0x208] sm:$0xf0]  ;;  %v4450_v50 = vld [vmem:[#allocation10 + $0x284] sm:$0xf] }
  0xf0   :  { %1731 = vmatpush.bf16.msra.mxu0 %v3291_v58  ;;  %v3696_v58 = vld [vmem:[#allocation10 + $0x348] sm:$0xf0] }
  0xf1   :  { %1744 = vmatpush.bf16.msra.mxu1 %v3355_v61  ;;  %v3699_v61 = vor.u32 %v4474_v57, %v3696_v58  ;;  %v3728_v57 = vld [vmem:[#allocation10 + $0x388] sm:$0xf0]  ;;  %v3846_v58 = vld [vmem:[#allocation14 + $0x70] sm:$0xf] }
  0xf2   :  { %1757 = vmatpush.bf16.msra.mxu2 %v3419_v62  ;;  %v3560_v62 = vld [vmem:[#allocation10 + $0x238] sm:$0xf0] }
  0xf3   :  { %1770 = vmatpush.bf16.msra.mxu3 %v3483_v3  ;;  %v4472_v3 = vld [vmem:[#allocation10 + $0x334] sm:$0xf]  ;;  %v3563_v11 = vor.u32 %v4440_v60, %v3560_v62 }
  0xf4   :  { %1732 = vmatpush.bf16.msra.mxu0 %v3283_v13  ;;  %v3627_v13 = vor.u32 %v4456_v63, %v3624_v0  ;;  %v3691_v14 = vor.u32 %v4472_v3, %v3688_v4 }
  0xf5   :  { %1745 = vmatpush.bf16.msra.mxu1 %v3347_v17  ;;  %v367_v17 = vperm.slane %v5319_v7, 0  ;;  %v727_v36 = vpop.f32.mrf.mxu1 }
  0xf6   :  { %1758 = vmatpush.bf16.msra.mxu2 %v3411_v21  ;;  %v3755_v21 = vor.u32 %v4488_v9, %v3752_v10  ;;  %v3838_v9 = vld [vmem:[#allocation14 + $0x60] sm:$0xf]  ;;  %v4543_v10 = vld [vmem:[#allocation14 + $0x64] sm:$0xf0] }
  0xf7   :  { %1771 = vmatpush.bf16.msra.mxu3 %v3475_v25  ;;  %1733 = vmatmul.bf16.vlgmr.msra.gmra.mxu0 %v5293_v5  ;;  %v3760_v5 = vld [vmem:[#allocation10 + $0x3c8] sm:$0xf0]  ;;  %v714_v29 = vpop.f32.mrf.mxu0 }
  0xf8   :  { %1777 = vmatpush.bf16.msrb.mxu0 %v3595_v26  ;;  %1746 = vmatmul.bf16.vlgmr.msra.gmra.mxu1 %v5297_v8  ;;  %v3763_v1 = vor.u32 %v4490_v59, %v3760_v5  ;;  %v3680_v25 = vld [vmem:[#allocation10 + $0x328] sm:$0xf0]  ;;  %v4486_v26 = vld [vmem:[#allocation10 + $0x3a4] sm:$0xf]  ;;  %v715_v35 = vadd.f32 %v714_v29, %v367_v17  ;;  %v4545_v59 = vld [vmem:[#allocation14 + $0x74] sm:$0xf0]  ;;  %v3539_v5 = vor.u32 %v4434_v45, %v3536_v48 }
  0xf9   :  { %1790 = vmatpush.bf16.msrb.mxu1 %v3659_v27  ;;  %1759 = vmatmul.bf16.vlgmr.msra.gmra.mxu2 %v5291_v2  ;;  %v4458_v2 = vld [vmem:[#allocation10 + $0x2c4] sm:$0xf]  ;;  %v3744_v27 = vld [vmem:[#allocation10 + $0x3a8] sm:$0xf0]  ;;  %v3683_v31 = vor.u32 %v4470_v24, %v3680_v25  ;;  %v3847_v3 = vor.u32 %v4545_v59, %v3846_v58  ;;  %v3830_v17 = vld [vmem:[#allocation14 + $0x50] sm:$0xf] }
  0xfa   :  { %1803 = vmatpush.bf16.msrb.mxu2 %v3723_v28  ;;  %1772 = vmatmul.bf16.vlgmr.msra.gmra.mxu3 %v5295_v6  ;;  %v3571_v6 = vor.u32 %v4442_v55, %v3568_v19  ;;  %v3635_v8 = vor.u32 %v4458_v2, %v3632_v22  ;;  %v3555_v28 = vor.u32 %v4438_v12, %v3552_v15  ;;  %v4466_v55 = vld [vmem:[#allocation10 + $0x304] sm:$0xf]  ;;  %v3664_v19 = vld [vmem:[#allocation10 + $0x308] sm:$0xf0]  ;;  %v3832_v24 = vld [vmem:[#allocation14 + $0x58] sm:$0xf0] }
  0xfb   :  { %1816 = vmatpush.bf16.msrb.mxu3 %v3787_v32  ;;  %v4436_v32 = vld [vmem:[#allocation10 + $0x214] sm:$0xf]  ;;  %v3747_v37 = vor.u32 %v4486_v26, %v3744_v27  ;;  %v728_v43 = vadd.f32 %v727_v36, %v715_v35  ;;  %v4482_v2 = vld [vmem:[#allocation10 + $0x384] sm:$0xf]  ;;  %v3667_v63 = vor.u32 %v4466_v55, %v3664_v19  ;;  %v3840_v12 = vld [vmem:[#allocation14 + $0x68] sm:$0xf0]  ;;  %v3839_v15 = vor.u32 %v4543_v10, %v3838_v9 }
  0xfc   :  { %1778 = vmatpush.bf16.msrb.mxu0 %v3587_v38  ;;  %v3608_v38 = vld [vmem:[#allocation10 + $0x298] sm:$0xf0]  ;;  %v368_v26 = vperm.slane %v5319_v7, 1  ;;  %v3835_v27 = vor.u32 %v4540_v23, %v3832_v24  ;;  %v4538_v29 = vld [vmem:[#allocation14 + $0x44] sm:$0xf] }
  0xfd   :  { %1791 = vmatpush.bf16.msrb.mxu1 %v3651_v39  ;;  %v4468_v39 = vld [vmem:[#allocation10 + $0x314] sm:$0xf]  ;;  %v3611_v46 = vor.u32 %v4452_v34, %v3608_v38  ;;  %v729_v0 = vpop.f32.mrf.mxu1  ;;  %v4537_v35 = vld [vmem:[#allocation14 + $0x34] sm:$0xf0]  ;;  %v3816_v36 = vld [vmem:[#allocation14 + $0x38] sm:$0xf0] }
  0xfe   :  { %1804 = vmatpush.bf16.msrb.mxu2 %v3715_v40  ;;  %v3672_v40 = vld [vmem:[#allocation10 + $0x318] sm:$0xf0]  ;;  %v3814_v34 = vld [vmem:[#allocation14 + $0x30] sm:$0xf]  ;;  %v3808_v45 = vld [vmem:[#allocation14 + $0x28] sm:$0xf0] }
  0xff   :  { %1817 = vmatpush.bf16.msrb.mxu3 %v3779_v44  ;;  %v3547_v44 = vor.u32 %v4436_v32, %v3544_v33  ;;  %v3675_v47 = vor.u32 %v4468_v39, %v3672_v40  ;;  %v753_v22 = vpop.f32.mrf.mxu3  ;;  %v716_v60 = vpop.f32.mrf.mxu0  ;;  %v3815_v7 = vor.u32 %v4537_v35, %v3814_v34  ;;  %v4532_v55 = vld [vmem:[#allocation14 + $0x14] sm:$0xf]  ;;  %v3800_v19 = vld [vmem:[#allocation14 + $0x18] sm:$0xf0]  ;;  %v4531_v58 = vld [vmem:[#allocation14 + $0x4] sm:$0xf0] }
 0x100   :  { %1779 = vmatpush.bf16.msrb.mxu0 %v3579_v51  ;;  %v3600_v51 = vld [vmem:[#allocation10 + $0x288] sm:$0xf0]  ;;  %v4512_v0 = vld [vmem:[#allocation13 + $0x74] sm:$0xf]  ;;  %v3958_v24 = vld [vmem:[#allocation13 + $0x50] sm:$0xf] }
 0x101   :  { %1792 = vmatpush.bf16.msrb.mxu1 %v3643_v52  ;;  %v740_v52 = vpop.f32.mrf.mxu2  ;;  %v3603_v62 = vor.u32 %v4450_v50, %v3600_v51  ;;  %v3792_v60 = vld [vmem:[#allocation14 + $0x8] sm:$0xf0] }
 0x102   :  { %1805 = vmatpush.bf16.msrb.mxu2 %v3707_v54  ;;  %v3739_v54 = vor.u32 %v4484_v41, %v3736_v42  ;;  %v3806_v42 = vld [vmem:[#allocation14 + $0x20] sm:$0xf]  ;;  %v3952_v34 = vld [vmem:[#allocation13 + $0x48] sm:$0xf0] }
 0x103   :  { %1818 = vmatpush.bf16.msrb.mxu3 %v3771_v56  ;;  %v741_v56 = vadd.f32 %v740_v52, %v728_v43  ;;  %v4535_v43 = vld [vmem:[#allocation14 + $0x24] sm:$0xf0]  ;;  %v3798_v52 = vld [vmem:[#allocation14 + $0x10] sm:$0xf] }
 0x104   :  { %1780 = vmatpush.bf16.msrb.mxu0 %v3571_v6  ;;  %v3807_v48 = vor.u32 %v4535_v43, %v3806_v42  ;;  %v3934_v42 = vld [vmem:[#allocation13 + $0x20] sm:$0xf]  ;;  %v4503_v43 = vld [vmem:[#allocation13 + $0x24] sm:$0xf0] }
 0x105   :  { %1793 = vmatpush.bf16.msrb.mxu1 %v3635_v8  ;;  %v5322_v6 = vadd.f32 %v753_v22, %v741_v56  ;;  %v4544_v8 = vld [vmem:[#allocation14 + $0x74] sm:$0xf]  ;;  %v3803_v22 = vor.u32 %v4532_v55, %v3800_v19  ;;  %v3910_v19 = vld [vmem:[#allocation14 + $0xf0] sm:$0xf] }
 0x106   :  { %1806 = vmatpush.bf16.msrb.mxu2 %v3699_v61  ;;  %v3848_v61 = vld [vmem:[#allocation14 + $0x78] sm:$0xf0]  ;;  %v4500_v55 = vld [vmem:[#allocation13 + $0x14] sm:$0xf] }
 0x107   :  { %1819 = vmatpush.bf16.msrb.mxu3 %v3763_v1  ;;  %v3731_v1 = vor.u32 %v4482_v2, %v3728_v57  ;;  %v3851_v4 = vor.u32 %v4544_v8, %v3848_v61  ;;  %v3790_v57 = vld [vmem:[#allocation14] sm:$0xf] }
 0x108   :  { %1781 = vmatpush.bf16.msrb.mxu0 %v3563_v11  ;;  %v4542_v11 = vld [vmem:[#allocation14 + $0x64] sm:$0xf]  ;;  %v3791_v8 = vor.u32 %v4531_v58, %v3790_v57  ;;  %v4560_v57 = vld [vmem:[#allocation14 + $0xf4] sm:$0xf]  ;;  %v3912_v58 = vld [vmem:[#allocation14 + $0xf8] sm:$0xf0] }
 0x109   :  { %1794 = vmatpush.bf16.msrb.mxu1 %v3627_v13  ;;  %v742_v13 = vpop.f32.mrf.mxu2  ;;  %v3843_v16 = vor.u32 %v4542_v11, %v3840_v12  ;;  %v3966_v11 = vld [vmem:[#allocation13 + $0x60] sm:$0xf]  ;;  %v4511_v12 = vld [vmem:[#allocation13 + $0x64] sm:$0xf0] }
 0x10a   :  { %1807 = vmatpush.bf16.msrb.mxu2 %v3691_v14  ;;  %v755_v14 = vpop.f32.mrf.mxu3  ;;  %v4510_v13 = vld [vmem:[#allocation13 + $0x64] sm:$0xf] }
 0x10b   :  { %1820 = vmatpush.bf16.msrb.mxu3 %v3755_v21  ;;  %v4541_v21 = vld [vmem:[#allocation14 + $0x54] sm:$0xf0]  ;;  %v3967_v14 = vor.u32 %v4511_v12, %v3966_v11  ;;  %v4559_v11 = vld [vmem:[#allocation14 + $0xe4] sm:$0xf0]  ;;  %v4558_v12 = vld [vmem:[#allocation14 + $0xe4] sm:$0xf] }
 0x10c   :  { %1782 = vmatpush.bf16.msrb.mxu0 %v3555_v28  ;;  %v3831_v25 = vor.u32 %v4541_v21, %v3830_v17  ;;  %v3822_v28 = vld [vmem:[#allocation14 + $0x40] sm:$0xf]  ;;  %v5331_v21 = vld [vmem:[#allocation11] sm:$0x3] }
 0x10d   :  { %1795 = vmatpush.bf16.msrb.mxu1 %v3619_v30  ;;  %v3824_v30 = vld [vmem:[#allocation14 + $0x48] sm:$0xf0] }
 0x10e   :  { %1808 = vmatpush.bf16.msrb.mxu2 %v3683_v31 }
 0x10f   :  { %1821 = vmatpush.bf16.msrb.mxu3 %v3747_v37 }
 0x110   :  { %1783 = vmatpush.bf16.msrb.mxu0 %v3547_v44  ;;  %v4534_v44 = vld [vmem:[#allocation14 + $0x24] sm:$0xf] }
 0x111   :  { %1796 = vmatpush.bf16.msrb.mxu1 %v3611_v46  ;;  %v3811_v51 = vor.u32 %v4534_v44, %v3808_v45  ;;  %v4502_v45 = vld [vmem:[#allocation13 + $0x24] sm:$0xf] }
 0x112   :  { %1809 = vmatpush.bf16.msrb.mxu2 %v3675_v47 }
 0x113   :  { %1822 = vmatpush.bf16.msrb.mxu3 %v3739_v54  ;;  %v4533_v54 = vld [vmem:[#allocation14 + $0x14] sm:$0xf0] }
 0x114   :  { %1784 = vmatpush.bf16.msrb.mxu0 %v3539_v5  ;;  %v766_v31 = vpop.f32.mrf.mxu0  ;;  %v3799_v2 = vor.u32 %v4533_v54, %v3798_v52  ;;  %v4530_v5 = vld [vmem:[#allocation14 + $0x4] sm:$0xf] }
 0x115   :  { %1797 = vmatpush.bf16.msrb.mxu1 %v3603_v62  ;;  %v779_v33 = vpop.f32.mrf.mxu1  ;;  %v3795_v61 = vor.u32 %v4530_v5, %v3792_v60  ;;  %v3974_v62 = vld [vmem:[#allocation13 + $0x70] sm:$0xf] }
 0x116   :  { %1810 = vmatpush.bf16.msrb.mxu2 %v3667_v63  ;;  %v4513_v63 = vld [vmem:[#allocation13 + $0x74] sm:$0xf0] }
 0x117   :  { %1823 = vmatpush.bf16.msrb.mxu3 %v3731_v1  ;;  %1785 = vmatmul.bf16.vlgmr.msrb.gmra.mxu0 %v5305_v18  ;;  %v4539_v18 = vld [vmem:[#allocation14 + $0x44] sm:$0xf0] }
 0x118   :  { %2059 = vmatpush.bf16.msra.mxu0 %v3847_v3  ;;  %1798 = vmatmul.bf16.vlgmr.msrb.gmra.mxu1 %v5309_v20  ;;  %v3823_v32 = vor.u32 %v4539_v18, %v3822_v28  ;;  %v767_v20 = vadd.f32 %v766_v31, %v368_v26  ;;  %v3975_v3 = vor.u32 %v4513_v63, %v3974_v62  ;;  %v4508_v26 = vld [vmem:[#allocation13 + $0x54] sm:$0xf]  ;;  %v3960_v18 = vld [vmem:[#allocation13 + $0x58] sm:$0xf0]  ;;  %v949_v31 = vperm.slane %v5331_v21, 0 }
 0x119   :  { %1811 = vmatmul.bf16.vlgmr.msrb.gmra.mxu2 %v5303_v49  ;;  %v3827_v49 = vor.u32 %v4538_v29, %v3824_v30  ;;  %v3963_v30 = vor.u32 %v4508_v26, %v3960_v18  ;;  %v4499_v62 = vld [vmem:[#allocation13 + $0x4] sm:$0xf0]  ;;  %v4498_v63 = vld [vmem:[#allocation13 + $0x4] sm:$0xf]  ;;  %v4556_v26 = vld [vmem:[#allocation14 + $0xd4] sm:$0xf] }
 0x11a   :  { %2085 = vmatpush.bf16.msra.mxu2 %v3851_v4  ;;  %1824 = vmatmul.bf16.vlgmr.msrb.gmra.mxu3 %v5307_v53  ;;  %v4536_v53 = vld [vmem:[#allocation14 + $0x34] sm:$0xf]  ;;  %v780_v37 = vadd.f32 %v779_v33, %v767_v20  ;;  %v3976_v4 = vld [vmem:[#allocation13 + $0x78] sm:$0xf0]  ;;  %v4507_v20 = vld [vmem:[#allocation13 + $0x44] sm:$0xf0] }
 0x11b   :  { %v3819_v39 = vor.u32 %v4536_v53, %v3816_v36  ;;  %v3979_v10 = vor.u32 %v4512_v0, %v3976_v4  ;;  %v4506_v33 = vld [vmem:[#allocation13 + $0x44] sm:$0xf]  ;;  %v3920_v0 = vld [vmem:[#allocation13 + $0x8] sm:$0xf0] }
 0x11c   :  { %2060 = vmatpush.bf16.msra.mxu0 %v3839_v15  ;;  %v792_v38 = vpop.f32.mrf.mxu2  ;;  %v768_v47 = vpop.f32.mrf.mxu0  ;;  %v3968_v15 = vld [vmem:[#allocation13 + $0x68] sm:$0xf0]  ;;  %v3955_v53 = vor.u32 %v4506_v33, %v3952_v34  ;;  %v3923_v4 = vor.u32 %v4498_v63, %v3920_v0  ;;  %v4554_v33 = vld [vmem:[#allocation14 + $0xc4] sm:$0xf] }
 0x11d   :  { %v793_v40 = vadd.f32 %v792_v38, %v780_v37  ;;  %v805_v41 = vpop.f32.mrf.mxu3  ;;  %v781_v50 = vpop.f32.mrf.mxu1  ;;  %v3971_v17 = vor.u32 %v4510_v13, %v3968_v15  ;;  %v3942_v37 = vld [vmem:[#allocation13 + $0x30] sm:$0xf]  ;;  %v4504_v38 = vld [vmem:[#allocation13 + $0x34] sm:$0xf]  ;;  %v3936_v47 = vld [vmem:[#allocation13 + $0x28] sm:$0xf0] }
 0x11e   :  { %2086 = vmatpush.bf16.msra.mxu2 %v3843_v16  ;;  %v3926_v50 = vld [vmem:[#allocation13 + $0x10] sm:$0xf]  ;;  %v3939_v54 = vor.u32 %v4502_v45, %v3936_v47  ;;  %v3888_v34 = vld [vmem:[#allocation14 + $0xc8] sm:$0xf0]  ;;  %v4551_v45 = vld [vmem:[#allocation14 + $0xa4] sm:$0xf0] }
 0x11f   :  { %v5329_v46 = vadd.f32 %v805_v41, %v793_v40  ;;  %v3944_v41 = vld [vmem:[#allocation13 + $0x38] sm:$0xf0]  ;;  %v3856_v0 = vld [vmem:[#allocation14 + $0x88] sm:$0xf0] }
 0x120   :  { %2061 = vmatpush.bf16.msra.mxu0 %v3831_v25  ;;  %v4509_v25 = vld [vmem:[#allocation13 + $0x54] sm:$0xf0]  ;;  %v3947_v44 = vor.u32 %v4504_v38, %v3944_v41  ;;  %v3880_v41 = vld [vmem:[#allocation14 + $0xb8] sm:$0xf0] }
 0x121   :  { %v3959_v28 = vor.u32 %v4509_v25, %v3958_v24  ;;  %v4557_v25 = vld [vmem:[#allocation14 + $0xd4] sm:$0xf0] }
 0x122   :  { %2087 = vmatpush.bf16.msra.mxu2 %v3835_v27 }
 0x124   :  { %2062 = vmatpush.bf16.msra.mxu0 %v3823_v32  ;;  %v794_v56 = vpop.f32.mrf.mxu2  ;;  %v3950_v32 = vld [vmem:[#allocation13 + $0x40] sm:$0xf] }
 0x125   :  { %v807_v59 = vpop.f32.mrf.mxu3  ;;  %v3928_v56 = vld [vmem:[#allocation13 + $0x18] sm:$0xf0] }
 0x126   :  { %2088 = vmatpush.bf16.msra.mxu2 %v3827_v49  ;;  %v3951_v49 = vor.u32 %v4507_v20, %v3950_v32  ;;  %v3915_v59 = vor.u32 %v4560_v57, %v3912_v58  ;;  %v3886_v32 = vld [vmem:[#allocation14 + $0xc0] sm:$0xf]  ;;  %v4555_v20 = vld [vmem:[#allocation14 + $0xc4] sm:$0xf0]  ;;  %v3864_v57 = vld [vmem:[#allocation14 + $0x98] sm:$0xf0] }
 0x128   :  { %2063 = vmatpush.bf16.msra.mxu0 %v3815_v7  ;;  %v4505_v7 = vld [vmem:[#allocation13 + $0x34] sm:$0xf0]  ;;  %2098 = vmatpush.bf16.msra.mxu3 %v3915_v59 }
 0x129   :  { %v3943_v40 = vor.u32 %v4505_v7, %v3942_v37  ;;  %v3878_v37 = vld [vmem:[#allocation14 + $0xb0] sm:$0xf]  ;;  %v4553_v7 = vld [vmem:[#allocation14 + $0xb4] sm:$0xf0] }
 0x12a   :  { %2089 = vmatpush.bf16.msra.mxu2 %v3819_v39 }
 0x12c   :  { %2064 = vmatpush.bf16.msra.mxu0 %v3807_v48  ;;  %v3935_v48 = vor.u32 %v4503_v43, %v3934_v42  ;;  %v3879_v42 = vor.u32 %v4553_v7, %v3878_v37  ;;  %v950_v7 = vperm.slane %v5331_v21, 1  ;;  %v3990_v21 = vld [vmem:[#allocation13 + $0x90] sm:$0xf] }
 0x12e   :  { %2090 = vmatpush.bf16.msra.mxu2 %v3811_v51  ;;  %v4501_v51 = vld [vmem:[#allocation13 + $0x14] sm:$0xf0] }
 0x12f   :  { %v3927_v5 = vor.u32 %v4501_v51, %v3926_v50 }
 0x130   :  { %2065 = vmatpush.bf16.msra.mxu0 %v3799_v2  ;;  %v4561_v2 = vld [vmem:[#allocation14 + $0xf4] sm:$0xf0] }
 0x132   :  { %2091 = vmatpush.bf16.msra.mxu2 %v3803_v22  ;;  %v3911_v22 = vor.u32 %v4561_v2, %v3910_v19  ;;  %v3862_v19 = vld [vmem:[#allocation14 + $0x90] sm:$0xf]  ;;  %v4549_v2 = vld [vmem:[#allocation14 + $0x94] sm:$0xf0] }
 0x133   :  { %v3863_v58 = vor.u32 %v4549_v2, %v3862_v19  ;;  %v4517_v19 = vld [vmem:[#allocation13 + $0x94] sm:$0xf0]  ;;  %v4516_v2 = vld [vmem:[#allocation13 + $0x94] sm:$0xf] }
 0x134   :  { %2066 = vmatpush.bf16.msra.mxu0 %v3791_v8  ;;  %v1630_v1 = vpop.f32.mrf.mxu0  ;;  %2072 = vmatpush.bf16.msra.mxu1 %v3911_v22  ;;  %v3931_v8 = vor.u32 %v4500_v55, %v3928_v56  ;;  %v4548_v22 = vld [vmem:[#allocation14 + $0x94] sm:$0xf] }
 0x135   :  { %v1643_v9 = vpop.f32.mrf.mxu1  ;;  %v1631_v39 = vadd.f32 %v1630_v1, %v949_v31  ;;  %v3867_v59 = vor.u32 %v4548_v22, %v3864_v57  ;;  %v3991_v57 = vor.u32 %v4517_v19, %v3990_v21  ;;  %v4591_v21 = vld [vmem:[#allocation17 + $0x64] sm:$0xf0] }
 0x136   :  { %2092 = vmatpush.bf16.msra.mxu2 %v3795_v61  ;;  %v3918_v61 = vld [vmem:[#allocation13] sm:$0xf] }
 0x137   :  { %v1644_v52 = vadd.f32 %v1643_v9, %v1631_v39  ;;  %v3919_v1 = vor.u32 %v4499_v62, %v3918_v61  ;;  %v4547_v61 = vld [vmem:[#allocation14 + $0x84] sm:$0xf0]  ;;  %v4546_v62 = vld [vmem:[#allocation14 + $0x84] sm:$0xf] }
 0x138   :  { %2271 = vmatpush.bf16.msrb.mxu0 %v3975_v3 }
 0x13a   :  { %2297 = vmatpush.bf16.msrb.mxu2 %v3979_v10  ;;  %v3902_v10 = vld [vmem:[#allocation14 + $0xe0] sm:$0xf] }
 0x13b   :  { %v3903_v15 = vor.u32 %v4559_v11, %v3902_v10  ;;  %v4528_v10 = vld [vmem:[#allocation13 + $0xf4] sm:$0xf]  ;;  %v4040_v11 = vld [vmem:[#allocation13 + $0xf8] sm:$0xf0] }
 0x13c   :  { %v1656_v16 = vpop.f32.mrf.mxu2  ;;  %2272 = vmatpush.bf16.msrb.mxu0 %v3967_v14  ;;  %v1632_v27 = vpop.f32.mrf.mxu0 }
 0x13d   :  { %v5333_v23 = vpop.f32.mrf.mxu3  ;;  %v1645_v29 = vpop.f32.mrf.mxu1  ;;  %v1657_v60 = vadd.f32 %v1656_v16, %v1644_v52  ;;  %v3904_v16 = vld [vmem:[#allocation14 + $0xe8] sm:$0xf0]  ;;  %v3896_v27 = vld [vmem:[#allocation14 + $0xd8] sm:$0xf0]  ;;  %2073 = vmatpush.bf16.msra.mxu1 %v3903_v15  ;;  %v4550_v52 = vld [vmem:[#allocation14 + $0xa4] sm:$0xf] }
 0x13e   :  { %2298 = vmatpush.bf16.msrb.mxu2 %v3971_v17  ;;  %v3894_v17 = vld [vmem:[#allocation14 + $0xd0] sm:$0xf]  ;;  %v3907_v24 = vor.u32 %v4558_v12, %v3904_v16  ;;  %v3899_v18 = vor.u32 %v4556_v26, %v3896_v27  ;;  %v4043_v12 = vor.u32 %v4528_v10, %v4040_v11  ;;  %v4527_v16 = vld [vmem:[#allocation13 + $0xe4] sm:$0xf0] }
 0x13f   :  { %v1670_v3 = vadd.f32 %v5333_v23, %v1657_v60  ;;  %v3895_v23 = vor.u32 %v4557_v25, %v3894_v17  ;;  %v4526_v17 = vld [vmem:[#allocation13 + $0xe4] sm:$0xf]  ;;  %v4032_v25 = vld [vmem:[#allocation13 + $0xe8] sm:$0xf0] }
 0x140   :  { %2273 = vmatpush.bf16.msrb.mxu0 %v3959_v28  ;;  %2099 = vmatpush.bf16.msra.mxu3 %v3907_v24  ;;  %v4035_v26 = vor.u32 %v4526_v17, %v4032_v25 }
 0x141   :  { %2074 = vmatpush.bf16.msra.mxu1 %v3895_v23  ;;  %v4525_v23 = vld [vmem:[#allocation13 + $0xd4] sm:$0xf0] }
 0x142   :  { %2299 = vmatpush.bf16.msrb.mxu2 %v3963_v30 }
 0x144   :  { %v1658_v35 = vpop.f32.mrf.mxu2  ;;  %2274 = vmatpush.bf16.msrb.mxu0 %v3951_v49  ;;  %v3887_v49 = vor.u32 %v4555_v20, %v3886_v32  ;;  %2100 = vmatpush.bf16.msra.mxu3 %v3899_v18  ;;  %v4524_v18 = vld [vmem:[#allocation13 + $0xd4] sm:$0xf] }
 0x145   :  { %v1671_v36 = vpop.f32.mrf.mxu3 }
 0x146   :  { %2300 = vmatpush.bf16.msrb.mxu2 %v3955_v53  ;;  %v3891_v36 = vor.u32 %v4554_v33, %v3888_v34  ;;  %2075 = vmatpush.bf16.msra.mxu1 %v3887_v49  ;;  %v4014_v49 = vld [vmem:[#allocation13 + $0xc0] sm:$0xf]  ;;  %v4523_v34 = vld [vmem:[#allocation13 + $0xc4] sm:$0xf0] }
 0x148   :  { %2275 = vmatpush.bf16.msrb.mxu0 %v3943_v40  ;;  %v4552_v40 = vld [vmem:[#allocation14 + $0xb4] sm:$0xf]  ;;  %2101 = vmatpush.bf16.msra.mxu3 %v3891_v36  ;;  %v4016_v36 = vld [vmem:[#allocation13 + $0xc8] sm:$0xf0] }
 0x14a   :  { %2301 = vmatpush.bf16.msrb.mxu2 %v3947_v44  ;;  %v3870_v44 = vld [vmem:[#allocation14 + $0xa0] sm:$0xf]  ;;  %2076 = vmatpush.bf16.msra.mxu1 %v3879_v42 }
 0x14b   :  { %v3871_v55 = vor.u32 %v4551_v45, %v3870_v44  ;;  %v4008_v44 = vld [vmem:[#allocation13 + $0xb8] sm:$0xf0]  ;;  %v3998_v45 = vld [vmem:[#allocation13 + $0xa0] sm:$0xf] }
 0x14c   :  { %2276 = vmatpush.bf16.msrb.mxu0 %v3935_v48  ;;  %v3883_v48 = vor.u32 %v4552_v40, %v3880_v41  ;;  %v4521_v40 = vld [vmem:[#allocation13 + $0xb4] sm:$0xf0]  ;;  %v4520_v41 = vld [vmem:[#allocation13 + $0xb4] sm:$0xf] }
 0x14e   :  { %2302 = vmatpush.bf16.msrb.mxu2 %v3939_v54  ;;  %v3872_v54 = vld [vmem:[#allocation14 + $0xa8] sm:$0xf0]  ;;  %2102 = vmatpush.bf16.msra.mxu3 %v3883_v48  ;;  %v4011_v48 = vor.u32 %v4520_v41, %v4008_v44  ;;  %v4563_v41 = vld [vmem:[%s5468_s9 + $0x8] sm:$0xff] }
 0x14f   :  { %v3875_v56 = vor.u32 %v4550_v52, %v3872_v54  ;;  %2077 = vmatpush.bf16.msra.mxu1 %v3871_v55  ;;  %v4571_v44 = vld [vmem:[%s5468_s9 + $0x48] sm:$0xff] }
 0x150   :  { %2277 = vmatpush.bf16.msrb.mxu0 %v3927_v5  ;;  %v809_v5 = vmul.f32 0.01, %v5322_v6 }
 0x152   :  { %2303 = vmatpush.bf16.msrb.mxu2 %v3931_v8  ;;  %2103 = vmatpush.bf16.msra.mxu3 %v3875_v56  ;;  %v811_v60 = vmax.f32 %v5322_v6, %v809_v5  ;;  %v3854_v8 = vld [vmem:[#allocation14 + $0x80] sm:$0xf]  ;;  %v3992_v56 = vld [vmem:[#allocation13 + $0x98] sm:$0xf0]  ;;  %v4515_v5 = vld [vmem:[#allocation13 + $0x84] sm:$0xf0] }
 0x153   :  { %2078 = vmatpush.bf16.msra.mxu1 %v3863_v58  ;;  %v3855_v63 = vor.u32 %v4547_v61, %v3854_v8  ;;  %v4030_v6 = vld [vmem:[#allocation13 + $0xe0] sm:$0xf]  ;;  %v3995_v58 = vor.u32 %v4516_v2, %v3992_v56  ;;  %v3984_v8 = vld [vmem:[#allocation13 + $0x88] sm:$0xf0]  ;;  %v4590_v2 = vld [vmem:[#allocation17 + $0x64] sm:$0xf] }
 0x154   :  { %v1682_v9 = vpop.f32.mrf.mxu0  ;;  %2278 = vmatpush.bf16.msrb.mxu0 %v3919_v1  ;;  %v4038_v1 = vld [vmem:[#allocation13 + $0xf0] sm:$0xf]  ;;  %v4031_v24 = vor.u32 %v4527_v16, %v4030_v6 }
 0x155   :  { %v1683_v13 = vadd.f32 %v1682_v9, %v1670_v3  ;;  %v1695_v14 = vpop.f32.mrf.mxu1  ;;  %v4529_v3 = vld [vmem:[#allocation13 + $0xf4] sm:$0xf0]  ;;  %v4160_v56 = vld [vmem:[#allocation17 + $0x68] sm:$0xf0] }
 0x156   :  { %2304 = vmatpush.bf16.msrb.mxu2 %v3923_v4  ;;  %2104 = vmatpush.bf16.msra.mxu3 %v3867_v59  ;;  %v3859_v4 = vor.u32 %v4546_v62, %v3856_v0  ;;  %v4039_v9 = vor.u32 %v4529_v3, %v4038_v1  ;;  %v3982_v59 = vld [vmem:[#allocation13 + $0x80] sm:$0xf] }
 0x157   :  { %v1696_v28 = vadd.f32 %v1695_v14, %v1683_v13  ;;  %2079 = vmatpush.bf16.msra.mxu1 %v3855_v63  ;;  %v813_v13 = vpack.c.bf16 %v811_v60, %v811_v60  ;;  %v4514_v60 = vld [vmem:[#allocation13 + $0x84] sm:$0xf]  ;;  %v3983_v62 = vor.u32 %v4515_v5, %v3982_v59  ;;  %v4589_v59 = vld [vmem:[#allocation17 + $0x54] sm:$0xf0] }
 0x158   :  { %v3987_v63 = vor.u32 %v4514_v60, %v3984_v8  ;;  %v4588_v60 = vld [vmem:[#allocation17 + $0x54] sm:$0xf]  ;;  %v4152_v8 = vld [vmem:[#allocation17 + $0x58] sm:$0xf0] }
 0x15a   :  { %2105 = vmatpush.bf16.msra.mxu3 %v3859_v4 }
 0x15b   :  { %2284 = vmatpush.bf16.msrb.mxu1 %v4039_v9 }
 0x15c   :  { %v1708_v29 = vpop.f32.mrf.mxu2  ;;  %v1684_v53 = vpop.f32.mrf.mxu0 }
 0x15d   :  { %v1709_v30 = vadd.f32 %v1708_v29, %v1696_v28  ;;  %v1721_v31 = vpop.f32.mrf.mxu3  ;;  %v1697_v38 = vpop.f32.mrf.mxu1  ;;  %v4022_v28 = vld [vmem:[#allocation13 + $0xd0] sm:$0xf]  ;;  %v4015_v53 = vor.u32 %v4523_v34, %v4014_v49  ;;  %v4577_v49 = vld [vmem:[%s5468_s9 + $0x78] sm:$0xff]  ;;  %v4567_v34 = vld [vmem:[%s5468_s9 + $0x28] sm:$0xff] }
 0x15e   :  { %2310 = vmatpush.bf16.msrb.mxu3 %v4043_v12 }
 0x15f   :  { %v1722_v35 = vadd.f32 %v1721_v31, %v1709_v30  ;;  %2285 = vmatpush.bf16.msrb.mxu1 %v4031_v24  ;;  %v4023_v30 = vor.u32 %v4525_v23, %v4022_v28  ;;  %v4024_v31 = vld [vmem:[#allocation13 + $0xd8] sm:$0xf0]  ;;  %v4569_v23 = vld [vmem:[%s5468_s9 + $0x38] sm:$0xff] }
 0x160   :  { %v4027_v32 = vor.u32 %v4524_v18, %v4024_v31 }
 0x161   :  { %v1829_v39 = vmul.f32 0.01, %v1722_v35 }
 0x162   :  { %2311 = vmatpush.bf16.msrb.mxu3 %v4035_v26  ;;  %v810_v26 = vmul.f32 0.01, %v5329_v46 }
 0x163   :  { %v1831_v43 = vmax.f32 %v1722_v35, %v1829_v39  ;;  %2286 = vmatpush.bf16.msrb.mxu1 %v4023_v30  ;;  %v4522_v35 = vld [vmem:[#allocation13 + $0xc4] sm:$0xf]  ;;  %v4006_v39 = vld [vmem:[#allocation13 + $0xb0] sm:$0xf] }
 0x164   :  { %v1710_v47 = vpop.f32.mrf.mxu2  ;;  %v4019_v37 = vor.u32 %v4522_v35, %v4016_v36  ;;  %v4566_v36 = vld [vmem:[%s5468_s9 + $0x20] sm:$0xff] }
 0x165   :  { %v1833_v50 = vpack.c.bf16 %v1831_v43, %v1831_v43  ;;  %v1723_v51 = vpop.f32.mrf.mxu3  ;;  %v4007_v43 = vor.u32 %v4521_v40, %v4006_v39  ;;  %v4519_v47 = vld [vmem:[#allocation13 + $0xa4] sm:$0xf0]  ;;  %v4564_v39 = vld [vmem:[%s5468_s9 + $0x10] sm:$0xff] }
 0x166   :  { %2312 = vmatpush.bf16.msrb.mxu3 %v4027_v32  ;;  %v4000_v51 = vld [vmem:[#allocation13 + $0xa8] sm:$0xf0]  ;;  %v3999_v54 = vor.u32 %v4519_v47, %v3998_v45  ;;  %v4573_v40 = vld [vmem:[%s5468_s9 + $0x58] sm:$0xff] }
 0x167   :  { %2067 = vmatmul.bf16.vlgmr.msra.gmra.mxu0 %v1833_v50  ;;  %2093 = vmatmul.bf16.vlgmr.msra.gmra.mxu2 %v1833_v50  ;;  %v4518_v50 = vld [vmem:[#allocation13 + $0xa4] sm:$0xf]  ;;  %v4570_v45 = vld [vmem:[%s5468_s9 + $0x40] sm:$0xff] }
 0x168   :  { %2287 = vmatpush.bf16.msrb.mxu1 %v4015_v53  ;;  %v4003_v55 = vor.u32 %v4518_v50, %v4000_v51  ;;  %2469 = vmatpush.bf16.msra.mxu0 %v4569_v23  ;;  %v4576_v53 = vld [vmem:[%s5468_s9 + $0x70] sm:$0xff]  ;;  %v4592_v51 = vld [vmem:[#allocation17 + $0x74] sm:$0xf] }
 0x169   :  { %v4593_v50 = vld [vmem:[#allocation17 + $0x74] sm:$0xf0] }
 0x16a   :  { %2313 = vmatpush.bf16.msrb.mxu3 %v4019_v37  ;;  %v4575_v37 = vld [vmem:[%s5468_s9 + $0x68] sm:$0xff] }
 0x16c   :  { %2288 = vmatpush.bf16.msrb.mxu1 %v4007_v43  ;;  %v4562_v43 = vld [vmem:[%s5468_s9] sm:$0xff] }
 0x16e   :  { %2314 = vmatpush.bf16.msrb.mxu3 %v4011_v48  ;;  %v4166_v48 = vld [vmem:[#allocation17 + $0x70] sm:$0xf] }
 0x170   :  { %2289 = vmatpush.bf16.msrb.mxu1 %v3999_v54  ;;  %v4168_v54 = vld [vmem:[#allocation17 + $0x78] sm:$0xf0] }
 0x171   :  { %v4171_v19 = vor.u32 %v4592_v51, %v4168_v54  ;;  %v4110_v51 = vld [vmem:[#allocation17] sm:$0xf]  ;;  %v4578_v54 = vld [vmem:[#allocation17 + $0x4] sm:$0xf] }
 0x172   :  { %2315 = vmatpush.bf16.msrb.mxu3 %v4003_v55  ;;  %v4158_v55 = vld [vmem:[#allocation17 + $0x60] sm:$0xf] }
 0x174   :  { %v1734_v14 = vpop.f32.mrf.mxu0  ;;  %2290 = vmatpush.bf16.msrb.mxu1 %v3991_v57  ;;  %v4163_v57 = vor.u32 %v4590_v2, %v4160_v56  ;;  %v4601_v2 = vld [vmem:[#allocation20 + $0x38] sm:$0xff] }
 0x175   :  { %v1747_v15 = vpop.f32.mrf.mxu1  ;;  %v1735_v52 = vadd.f32 %v1734_v14, %v950_v7  ;;  %v4565_v7 = vld [vmem:[%s5468_s9 + $0x18] sm:$0xff]  ;;  %v4609_v56 = vld [vmem:[#allocation20 + $0x78] sm:$0xff] }
 0x176   :  { %2316 = vmatpush.bf16.msrb.mxu3 %v3995_v58  ;;  %v4150_v58 = vld [vmem:[#allocation17 + $0x50] sm:$0xf] }
 0x177   :  { %2279 = vmatmul.bf16.vlgmr.msrb.gmra.mxu0 %v813_v13  ;;  %2305 = vmatmul.bf16.vlgmr.msrb.gmra.mxu2 %v813_v13  ;;  %v1748_v22 = vadd.f32 %v1747_v15, %v1735_v52  ;;  %v4167_v52 = vor.u32 %v4593_v50, %v4166_v48  ;;  %v4120_v48 = vld [vmem:[#allocation17 + $0x18] sm:$0xf0] }
 0x178   :  { %2291 = vmatpush.bf16.msrb.mxu1 %v3983_v62  ;;  %v4151_v62 = vor.u32 %v4589_v59, %v4150_v58  ;;  %v4599_v58 = vld [vmem:[#allocation20 + $0x28] sm:$0xff] }
 0x179   :  { %2600 = vmatpush.bf16.msra.mxu2 %v4167_v52  ;;  %v4579_v52 = vld [vmem:[#allocation17 + $0x4] sm:$0xf0] }
 0x17a   :  { %2317 = vmatpush.bf16.msrb.mxu3 %v3987_v63  ;;  %v4155_v63 = vor.u32 %v4588_v60, %v4152_v8  ;;  %v4607_v59 = vld [vmem:[#allocation20 + $0x68] sm:$0xff]  ;;  %v4606_v60 = vld [vmem:[#allocation20 + $0x60] sm:$0xff]  ;;  %v4597_v8 = vld [vmem:[#allocation20 + $0x18] sm:$0xff] }
 0x17c   :  { %v1760_v27 = vpop.f32.mrf.mxu2  ;;  %v1736_v20 = vpop.f32.mrf.mxu0 }
 0x17d   :  { %v1773_v29 = vpop.f32.mrf.mxu3  ;;  %v1749_v33 = vpop.f32.mrf.mxu1  ;;  %v1761_v61 = vadd.f32 %v1760_v27, %v1748_v22  ;;  %v812_v27 = vmax.f32 %v5329_v46, %v810_v26  ;;  %v4568_v46 = vld [vmem:[%s5468_s9 + $0x30] sm:$0xff]  ;;  %v4159_v22 = vor.u32 %v4591_v21, %v4158_v55  ;;  %v4111_v55 = vor.u32 %v4579_v52, %v4110_v51  ;;  %v4112_v21 = vld [vmem:[#allocation17 + $0x8] sm:$0xf0] }
 0x17e   :  { %2470 = vmatpush.bf16.msra.mxu0 %v4568_v46 }
 0x17f   :  { %v1774_v0 = vadd.f32 %v1773_v29, %v1761_v61  ;;  %v814_v28 = vpack.c.bf16 %v812_v27, %v812_v27  ;;  %2601 = vmatpush.bf16.msra.mxu2 %v4159_v22  ;;  %v4600_v22 = vld [vmem:[#allocation20 + $0x30] sm:$0xff] }
 0x182   :  { %2471 = vmatpush.bf16.msra.mxu0 %v4567_v34 }
 0x183   :  { %2602 = vmatpush.bf16.msra.mxu2 %v4151_v62 }
 0x184   :  { %v1762_v38 = vpop.f32.mrf.mxu2 }
 0x185   :  { %v1775_v42 = vpop.f32.mrf.mxu3  ;;  %v4574_v38 = vld [vmem:[%s5468_s9 + $0x60] sm:$0xff] }
 0x186   :  { %2472 = vmatpush.bf16.msra.mxu0 %v4566_v36  ;;  %v4572_v42 = vld [vmem:[%s5468_s9 + $0x50] sm:$0xff] }
 0x18a   :  { %2473 = vmatpush.bf16.msra.mxu0 %v4565_v7 }
 0x18e   :  { %2474 = vmatpush.bf16.msra.mxu0 %v4564_v39  ;;  %v4582_v39 = vld [vmem:[#allocation17 + $0x24] sm:$0xf] }
 0x192   :  { %2475 = vmatpush.bf16.msra.mxu0 %v4563_v41  ;;  %v4128_v41 = vld [vmem:[#allocation17 + $0x28] sm:$0xf0] }
 0x194   :  { %v1786_v1 = vpop.f32.mrf.mxu0 }
 0x195   :  { %v1799_v3 = vpop.f32.mrf.mxu1  ;;  %v1787_v4 = vadd.f32 %v1786_v1, %v1774_v0  ;;  %v4142_v0 = vld [vmem:[#allocation17 + $0x40] sm:$0xf]  ;;  %v4587_v1 = vld [vmem:[#allocation17 + $0x44] sm:$0xf0] }
 0x196   :  { %2476 = vmatpush.bf16.msra.mxu0 %v4562_v43  ;;  %v4118_v43 = vld [vmem:[#allocation17 + $0x10] sm:$0xf] }
 0x197   :  { %v1800_v9 = vadd.f32 %v1799_v3, %v1787_v4  ;;  %v4586_v3 = vld [vmem:[#allocation17 + $0x44] sm:$0xf]  ;;  %v4144_v4 = vld [vmem:[#allocation17 + $0x48] sm:$0xf0] }
 0x19a   :  { %2764 = vmatpush.bf16.msrb.mxu0 %v4601_v2  ;;  %v4618_v2 = vld [vmem:[%s5476_s17] sm:$0xff] }
 0x19c   :  { %v1812_v10 = vpop.f32.mrf.mxu2  ;;  %v1788_v13 = vpop.f32.mrf.mxu0 }
 0x19d   :  { %v1813_v11 = vadd.f32 %v1812_v10, %v1800_v9  ;;  %v1825_v12 = vpop.f32.mrf.mxu3  ;;  %v1801_v14 = vpop.f32.mrf.mxu1  ;;  %v2323_v10 = vld [vmem:[#allocation16] sm:$0x3] }
 0x19e   :  { %v2326_v27 = vperm.slane %v2323_v10, 1  ;;  %2765 = vmatpush.bf16.msrb.mxu0 %v4600_v22 }
 0x19f   :  { %v1826_v15 = vadd.f32 %v1825_v12, %v1813_v11  ;;  %v4143_v11 = vor.u32 %v4587_v1, %v4142_v0  ;;  %v4147_v12 = vor.u32 %v4586_v3, %v4144_v4  ;;  %v4596_v0 = vld [vmem:[#allocation20 + $0x10] sm:$0xff] }
 0x1a0   :  { %v4604_v1 = vld [vmem:[#allocation20 + $0x50] sm:$0xff] }
 0x1a1   :  { %v1830_v6 = vmul.f32 0.01, %v1826_v15  ;;  %2603 = vmatpush.bf16.msra.mxu2 %v4143_v11 }
 0x1a2   :  { %2766 = vmatpush.bf16.msrb.mxu0 %v4599_v58 }
 0x1a3   :  { %v1832_v16 = vmax.f32 %v1826_v15, %v1830_v6  ;;  %v2325_v15 = vperm.slane %v2323_v10, 0 }
 0x1a4   :  { %v1814_v17 = vpop.f32.mrf.mxu2 }
 0x1a5   :  { %v1834_v24 = vpack.c.bf16 %v1832_v16, %v1832_v16  ;;  %v1827_v25 = vpop.f32.mrf.mxu3 }
 0x1a7   :  { %2080 = vmatmul.bf16.vlgmr.msra.gmra.mxu1 %v1834_v24  ;;  %2106 = vmatmul.bf16.vlgmr.msra.gmra.mxu3 %v1834_v24 }
 0x1a8   :  { %2482 = vmatpush.bf16.msra.mxu1 %v4577_v49  ;;  %2613 = vmatpush.bf16.msra.mxu3 %v4171_v19  ;;  %v4115_v19 = vor.u32 %v4578_v54, %v4112_v21 }
 0x1ac   :  { %2483 = vmatpush.bf16.msra.mxu1 %v4576_v53  ;;  %2614 = vmatpush.bf16.msra.mxu3 %v4163_v57  ;;  %v4584_v53 = vld [vmem:[#allocation17 + $0x34] sm:$0xf] }
 0x1ad   :  { %v4608_v57 = vld [vmem:[#allocation20 + $0x70] sm:$0xff] }
 0x1b0   :  { %2484 = vmatpush.bf16.msra.mxu1 %v4575_v37  ;;  %2615 = vmatpush.bf16.msra.mxu3 %v4155_v63  ;;  %v4136_v37 = vld [vmem:[#allocation17 + $0x38] sm:$0xf0]  ;;  %v4648_v63 = vld [vmem:[%s5469_s10] ss:$0 sm:$0xff]  ;;  %s5496_s10 = sld [smem:[#allocation45_spill]] }
 0x1b1   :  { %v4139_v7 = vor.u32 %v4584_v53, %v4136_v37 }
 0x1b4   :  { %2485 = vmatpush.bf16.msra.mxu1 %v4574_v38  ;;  %2616 = vmatpush.bf16.msra.mxu3 %v4147_v12  ;;  %v4583_v38 = vld [vmem:[#allocation17 + $0x24] sm:$0xf0] }
 0x1b6   :  { %v4625_v22 = vld [vmem:[%s5496_s10 + $0x8] sm:$0xff] }
 0x1b7   :  { %2292 = vmatmul.bf16.vlgmr.msrb.gmra.mxu1 %v814_v28  ;;  %2318 = vmatmul.bf16.vlgmr.msrb.gmra.mxu3 %v814_v28 }
 0x1b8   :  { %2486 = vmatpush.bf16.msra.mxu1 %v4573_v40  ;;  %2617 = vmatpush.bf16.msra.mxu3 %v4139_v7 }
 0x1bc   :  { %2487 = vmatpush.bf16.msra.mxu1 %v4572_v42  ;;  %v4131_v42 = vor.u32 %v4582_v39, %v4128_v41  ;;  %v4610_v39 = vld [vmem:[%s5474_s15] sm:$0xff] }
 0x1bd   :  { %v4622_v41 = vld [vmem:[%s5476_s17 + $0x20] sm:$0xff] }
 0x1be   :  { %2618 = vmatpush.bf16.msra.mxu3 %v4131_v42  ;;  %v4621_v42 = vld [vmem:[%s5476_s17 + $0x18] sm:$0xff] }
 0x1c0   :  { %2488 = vmatpush.bf16.msra.mxu1 %v4571_v44  ;;  %v4581_v44 = vld [vmem:[#allocation17 + $0x14] sm:$0xf0] }
 0x1c4   :  { %2489 = vmatpush.bf16.msra.mxu1 %v4570_v45  ;;  %v4580_v45 = vld [vmem:[#allocation17 + $0x14] sm:$0xf] }
 0x1c5   :  { %v4123_v50 = vor.u32 %v4580_v45, %v4120_v48 }
 0x1c7   :  { %2619 = vmatpush.bf16.msra.mxu3 %v4123_v50 }
 0x1c8   :  { %2777 = vmatpush.bf16.msrb.mxu1 %v4609_v56  ;;  %v4626_v56 = vld [vmem:[%s5496_s10 + $0x10] sm:$0xff] }
 0x1cb   :  { %2620 = vmatpush.bf16.msra.mxu3 %v4115_v19  ;;  %v4619_v19 = vld [vmem:[%s5476_s17 + $0x8] sm:$0xff] }
 0x1cc   :  { %2778 = vmatpush.bf16.msrb.mxu1 %v4608_v57  ;;  %v4650_v57 = vld [vmem:[#allocation23] ss:$0 sm:$0xff] }
 0x1d0   :  { %2779 = vmatpush.bf16.msrb.mxu1 %v4607_v59 }
 0x1d4   :  { %2780 = vmatpush.bf16.msrb.mxu1 %v4606_v60 }
 0x1e4   :  { %v5345_v18 = vpop.f32.mrf.mxu0 }
 0x1ea   :  { %v5347_v29 = vpop.f32.mrf.mxu2 }
 0x1ec   :  { %v2070_v30 = vpop.f32.mrf.mxu0 }
 0x1f2   :  { %v2096_v31 = vpop.f32.mrf.mxu2 }
 0x1f4   :  { %v5349_v32 = vpop.f32.mrf.mxu0 }
 0x1fa   :  { %v5351_v20 = vpop.f32.mrf.mxu2 }
 0x1fc   :  { %v2282_v33 = vpop.f32.mrf.mxu0 }
 0x202   :  { %v2308_v35 = vpop.f32.mrf.mxu2 }
 0x203   :  { %v4585_v35 = vld [vmem:[#allocation17 + $0x34] sm:$0xf0] }
 0x224   :  { %v2081_v47 = vpop.f32.mrf.mxu1 }
 0x225   :  { %v2082_v9 = vadd.f32 %v2081_v47, %v5345_v18  ;;  %v4119_v47 = vor.u32 %v4581_v44, %v4118_v43  ;;  %v4620_v43 = vld [vmem:[%s5476_s17 + $0x10] sm:$0xff]  ;;  %v4649_v44 = vld [vmem:[#allocation22] ss:$0 sm:$0xff] }
 0x227   :  { %v2281_v14 = vadd.f32 %v5349_v32, %v2082_v9 }
 0x22a   :  { %v2107_v5 = vpop.f32.mrf.mxu3 }
 0x22b   :  { %v2108_v16 = vadd.f32 %v2107_v5, %v5347_v29  ;;  %v4134_v29 = vld [vmem:[#allocation17 + $0x30] sm:$0xf]  ;;  %v4598_v5 = vld [vmem:[#allocation20 + $0x20] sm:$0xff] }
 0x22c   :  { %v2083_v61 = vpop.f32.mrf.mxu1  ;;  %v4135_v36 = vor.u32 %v4585_v35, %v4134_v29  ;;  %2767 = vmatpush.bf16.msrb.mxu0 %v4598_v5 }
 0x22d   :  { %v2307_v26 = vadd.f32 %v5351_v20, %v2108_v16  ;;  %v4126_v20 = vld [vmem:[#allocation17 + $0x20] sm:$0xf] }
 0x22e   :  { %2604 = vmatpush.bf16.msra.mxu2 %v4135_v36  ;;  %v4127_v40 = vor.u32 %v4583_v38, %v4126_v20  ;;  %v4605_v61 = vld [vmem:[#allocation20 + $0x58] sm:$0xff]  ;;  %v4594_v16 = vld [vmem:[#allocation20] sm:$0xff]  ;;  %v4611_v38 = vld [vmem:[%s5474_s15 + $0x8] sm:$0xff] }
 0x22f   :  { %2781 = vmatpush.bf16.msrb.mxu1 %v4605_v61  ;;  %v4612_v20 = vld [vmem:[%s5474_s15 + $0x10] sm:$0xff] }
 0x230   :  { %2768 = vmatpush.bf16.msrb.mxu0 %v4597_v8 }
 0x232   :  { %v2109_v13 = vpop.f32.mrf.mxu3  ;;  %2605 = vmatpush.bf16.msra.mxu2 %v4127_v40  ;;  %v4623_v40 = vld [vmem:[%s5476_s17 + $0x28] sm:$0xff] }
 0x233   :  { %2782 = vmatpush.bf16.msrb.mxu1 %v4604_v1  ;;  %2935 = vmatpush.bf16.msrb.mxu3 %v4623_v40 }
 0x234   :  { %v2293_v6 = vpop.f32.mrf.mxu1  ;;  %2769 = vmatpush.bf16.msrb.mxu0 %v4596_v0 }
 0x235   :  { %v2294_v17 = vadd.f32 %v2293_v6, %v2281_v14  ;;  %v4603_v6 = vld [vmem:[#allocation20 + $0x48] sm:$0xff] }
 0x236   :  { %2606 = vmatpush.bf16.msra.mxu2 %v4119_v47 }
 0x237   :  { %v2329_v24 = vadd.f32 %v2325_v15, %v2294_v17  ;;  %v4595_v15 = vld [vmem:[#allocation20 + $0x8] sm:$0xff]  ;;  %2783 = vmatpush.bf16.msrb.mxu1 %v4603_v6  ;;  %v4602_v17 = vld [vmem:[#allocation20 + $0x40] sm:$0xff]  ;;  %2936 = vmatpush.bf16.msrb.mxu3 %v4622_v41 }
 0x238   :  { %2770 = vmatpush.bf16.msrb.mxu0 %v4595_v15 }
 0x239   :  { %v2331_v25 = vmul.f32 0.01, %v2329_v24 }
 0x23a   :  { %v2319_v28 = vpop.f32.mrf.mxu3  ;;  %2607 = vmatpush.bf16.msra.mxu2 %v4111_v55 }
 0x23b   :  { %v2333_v23 = vmax.f32 %v2329_v24, %v2331_v25  ;;  %v2320_v18 = vadd.f32 %v2319_v28, %v2307_v26  ;;  %2784 = vmatpush.bf16.msrb.mxu1 %v4602_v17  ;;  %v4617_v24 = vld [vmem:[%s5474_s15 + $0x38] sm:$0xff]  ;;  %v4616_v25 = vld [vmem:[%s5474_s15 + $0x30] sm:$0xff]  ;;  %v4615_v26 = vld [vmem:[%s5474_s15 + $0x28] sm:$0xff]  ;;  %2937 = vmatpush.bf16.msrb.mxu3 %v4621_v42 }
 0x23c   :  { %v2295_v30 = vpop.f32.mrf.mxu1  ;;  %2771 = vmatpush.bf16.msrb.mxu0 %v4594_v16  ;;  %v4613_v28 = vld [vmem:[%s5474_s15 + $0x18] sm:$0xff] }
 0x23d   :  { %v2335_v31 = vpack.c.bf16 %v2333_v23, %v2333_v23  ;;  %v2330_v33 = vadd.f32 %v2326_v27, %v2320_v18  ;;  %v4614_v27 = vld [vmem:[%s5474_s15 + $0x20] sm:$0xff]  ;;  %v2514_v23 = vld [vmem:[#allocation19] sm:$0x3] }
 0x23e   :  { %2861 = vmatpush.bf16.msrb.mxu2 %v4617_v24  ;;  %v2516_v18 = vperm.slane %v2514_v23, 0  ;;  %v2517_v30 = vperm.slane %v2514_v23, 1 }
 0x23f   :  { %v2332_v46 = vmul.f32 0.01, %v2330_v33  ;;  %2477 = vmatmul.bf16.vlgmr.msra.gmra.mxu0 %v2335_v31  ;;  %2938 = vmatpush.bf16.msrb.mxu3 %v4620_v43 }
 0x241   :  { %v2334_v32 = vmax.f32 %v2330_v33, %v2332_v46 }
 0x242   :  { %v2321_v49 = vpop.f32.mrf.mxu3  ;;  %2862 = vmatpush.bf16.msrb.mxu2 %v4616_v25 }
 0x243   :  { %v2336_v34 = vpack.c.bf16 %v2334_v32, %v2334_v32  ;;  %2939 = vmatpush.bf16.msrb.mxu3 %v4619_v19 }
 0x245   :  { %2490 = vmatmul.bf16.vlgmr.msra.gmra.mxu1 %v2336_v34 }
 0x246   :  { %2863 = vmatpush.bf16.msrb.mxu2 %v4615_v26 }
 0x247   :  { %2940 = vmatpush.bf16.msrb.mxu3 %v4618_v2 }
 0x24a   :  { %2864 = vmatpush.bf16.msrb.mxu2 %v4614_v27 }
 0x24e   :  { %2865 = vmatpush.bf16.msrb.mxu2 %v4613_v28 }
 0x252   :  { %2866 = vmatpush.bf16.msrb.mxu2 %v4612_v20 }
 0x256   :  { %2867 = vmatpush.bf16.msrb.mxu2 %v4611_v38 }
 0x25a   :  { %2868 = vmatpush.bf16.msrb.mxu2 %v4610_v39 }
 0x2bc   :  { %v2478_v62 = vpop.f32.mrf.mxu0 }
 0x2bd   :  { %v2479_v3 = vadd.f32 %v4648_v63, %v2478_v62  ;;  %v4624_v62 = vld [vmem:[%s5496_s10] sm:$0xff]  ;;  %v4651_v63 = vld [vmem:[#allocation25] ss:$0 sm:$0xff] }
 0x2c2   :  { %v2491_v4 = vpop.f32.mrf.mxu1 }
 0x2c3   :  { %v2492_v9 = vadd.f32 %v2491_v4, %v2479_v3 }
 0x2c4   :  { %v2480_v10 = vpop.f32.mrf.mxu0 }
 0x2c5   :  { %v2495_v11 = vmul.f32 0.01, %v2492_v9 }
 0x2c7   :  { %v2496_v12 = vmax.f32 %v2492_v9, %v2495_v11  ;;  %v4652_v11 = vld [vmem:[#allocation26] ss:$0 sm:$0xff] }
 0x2c9   :  { %v2497_v13 = vpack.c.bf16 %v2496_v12, %v2496_v12 }
 0x2ca   :  { %v2493_v14 = vpop.f32.mrf.mxu1 }
 0x2cb   :  { %2608 = vmatmul.bf16.vlgmr.msra.gmra.mxu2 %v2497_v13  ;;  %2621 = vmatmul.bf16.vlgmr.msra.gmra.mxu3 %v2497_v13 }
 0x2cc   :  { %2986 = vmatpush.bf16.msra.mxu3 %v4626_v56 }
 0x2d0   :  { %2987 = vmatpush.bf16.msra.mxu3 %v4625_v22 }
 0x2d4   :  { %2988 = vmatpush.bf16.msra.mxu3 %v4624_v62 }
 0x34e   :  { %v2609_v31 = vpop.f32.mrf.mxu2  ;;  %v2622_v33 = vpop.f32.mrf.mxu3 }
 0x34f   :  { %v2610_v46 = vadd.f32 %v2609_v31, %v2516_v18  ;;  %v2623_v32 = vadd.f32 %v2622_v33, %v2517_v30 }
 0x351   :  { %v2626_v49 = vmul.f32 0.01, %v2610_v46  ;;  %v2627_v34 = vmul.f32 0.01, %v2623_v32 }
 0x353   :  { %v2628_v29 = vmax.f32 %v2610_v46, %v2626_v49  ;;  %v2629_v35 = vmax.f32 %v2623_v32, %v2627_v34 }
 0x355   :  { %v2630_v53 = vpack.c.bf16 %v2628_v29, %v2628_v29  ;;  %v2631_v36 = vpack.c.bf16 %v2629_v35, %v2629_v35 }
 0x356   :  { %v2611_v37 = vpop.f32.mrf.mxu2  ;;  %v2624_v7 = vpop.f32.mrf.mxu3 }
 0x357   :  { %2772 = vmatmul.bf16.vlgmr.msrb.gmra.mxu0 %v2630_v53  ;;  %2785 = vmatmul.bf16.vlgmr.msrb.gmra.mxu1 %v2631_v36 }
 0x3d4   :  { %v2773_v45 = vpop.f32.mrf.mxu0  ;;  %v2786_v47 = vpop.f32.mrf.mxu1 }
 0x3d5   :  { %v2774_v48 = vadd.f32 %v4649_v44, %v2773_v45 }
 0x3d7   :  { %v2787_v50 = vadd.f32 %v2786_v47, %v2774_v48 }
 0x3d9   :  { %v2790_v51 = vmul.f32 0.01, %v2787_v50 }
 0x3db   :  { %v2791_v52 = vmax.f32 %v2787_v50, %v2790_v51 }
 0x3dc   :  { %v2775_v54 = vpop.f32.mrf.mxu0  ;;  %v2788_v55 = vpop.f32.mrf.mxu1 }
 0x3dd   :  { %v2792_v21 = vpack.c.bf16 %v2791_v52, %v2791_v52 }
 0x3df   :  { %2869 = vmatmul.bf16.vlgmr.msrb.gmra.mxu2 %v2792_v21 }
 0x462   :  { %v2870_v58 = vpop.f32.mrf.mxu2 }
 0x463   :  { %v2871_v59 = vadd.f32 %v4650_v57, %v2870_v58 }
 0x465   :  { %v2874_v5 = vmul.f32 0.01, %v2871_v59 }
 0x467   :  { %v2875_v60 = vmax.f32 %v2871_v59, %v2874_v5 }
 0x469   :  { %v2876_v8 = vpack.c.bf16 %v2875_v60, %v2875_v60 }
 0x46a   :  { %v2872_v61 = vpop.f32.mrf.mxu2 }
 0x46b   :  { %4292 = vmatmul.msk.bf16.vlgmr.msrb.gmra.mxu3 %vm2929_vm0, %v2876_v8 }
 0x4ee   :  { %v2942_v0 = vpop.f32.mrf.mxu3 }
 0x4ef   :  { %v2943_v1 = vadd.f32 %v4651_v63, %v2942_v0 }
 0x4f1   :  { %v2946_v3 = vmul.f32 0.01, %v2943_v1 }
 0x4f3   :  { %v2947_v4 = vmax.f32 %v2943_v1, %v2946_v3 }
 0x4f5   :  { %v2948_v9 = vpack.c.bf16 %v2947_v4, %v2947_v4 }
 0x4f6   :  { %v2944_v10 = vpop.f32.mrf.mxu3 }
 0x4f7   :  { %4305 = vmatmul.msk.bf16.vlgmr.msra.gmra.mxu3 %vm2977_vm1, %v2948_v9 }
 0x57a   :  { %v2990_v12 = vpop.f32.mrf.mxu3 }
 0x57b   :  { %v2991_v13 = vadd.f32 %v4652_v11, %v2990_v12 }
 0x57d   :  { %2994 = vst [vmem:[#allocation28] sm:$0xff] %v2991_v13 }
 0x57e   :  { %3005 = dma.vmem_to_hbm [thread:$0]  %s3001_s24, 128, %s3003_s26, [#allocation4]  }
 0x582   :  { %v2992_v14 = vpop.f32.mrf.mxu3 }
 0x583   :  { %5079 = dma.done.wait [#allocation4], 128  }
 0x584   :  { %5080 = vsyncadd [#allocation4], 4294967168 }
 0x585   :  { %3010 = vsyncpa [#allocation3], 1 }
 0x586   :  { %3011 = vsyncpa [#allocation6], 1 }
 0x587   :  { %3012 = vsyncpa [#allocation9], 1 }
 0x588   :  { %3013 = vsyncpa [#allocation12], 1 }
 0x589   :  { %3014 = vsyncpa [#allocation15], 1 }
 0x58a   :  { %3015 = vsyncpa [#allocation18], 1 }
 0x58b   :  { %3016 = vsyncpa [#allocation21], 1 }
 0x58c   :  { %3017 = vsyncpa [#allocation24], 1 }
 0x58d   :  { %3018 = vsyncpa [#allocation27], 1 }
 0x58e   :  { %3019 = vsyncpa [#allocation4], 1 }

</bundles_post_ra>
